<compile_context>
chip_gen: v6e
topology: v6e:2x2x1
jax: 0.10.0
libtpu: 0.0.40
codegen_flags: <defaults>
</compile_context>

<pallas_src>
import math

import jax
import jax.numpy as jnp
from jax.experimental import pallas as pl
from jax.experimental.pallas import tpu as pltpu

EPSILON = 1e-8

EMB_DIM = 32            # emb_dim
HID_DIM = 32            # hidden_dim
TIME_DIM = 2 * EMB_DIM  # 64
HALF = EMB_DIM // 2     # 16

# packed input layout (lane axis): [x3d(32) | t(1) | pos_atom(3) | pos_center(3)]
PACK_W = EMB_DIM + 1 + 3 + 3          # 39
# packed output layout: [time_attr(64) | atom_repr(32) | edge_attr(32)] = 128 lanes
OUT_W = TIME_DIM + HID_DIM + HID_DIM  # 128


def _dot(a, b):
    # MXU matmul: bf16 operands, f32 accumulation.
    return jnp.dot(a.astype(jnp.bfloat16), b.astype(jnp.bfloat16),
                   preferred_element_type=jnp.float32)


# ---------------------------------------------------------------------------
# Fused kernel: timestep embedding -> time_embed -> intra_time_emb_layers
#               -> atom_emb  AND  coord2basis -> coeffs -> GaussianFourier
#               -> coff_mlp -> project, one 128-lane output per row tile.
# ---------------------------------------------------------------------------
def _fused_kernel(feat_ref, freqs_ref,
                  w1_ref, b1_ref, w2_ref, b2_ref, w3_ref, b3_ref,
                  wa_ref, ba_ref, wf_ref, wc_ref, bc_ref,
                  wp1_ref, bp1_ref, wp2_ref, bp2_ref,
                  out_ref):
    feat = feat_ref[...]                                   # (T, PACK_W) f32
    x3d = feat[:, :EMB_DIM]                                # (T, 32)
    t = feat[:, EMB_DIM:EMB_DIM + 1]                       # (T, 1)
    ax = feat[:, EMB_DIM + 1:EMB_DIM + 2]
    ay = feat[:, EMB_DIM + 2:EMB_DIM + 3]
    az = feat[:, EMB_DIM + 3:EMB_DIM + 4]
    cx = feat[:, EMB_DIM + 4:EMB_DIM + 5]
    cy = feat[:, EMB_DIM + 5:EMB_DIM + 6]
    cz = feat[:, EMB_DIM + 6:EMB_DIM + 7]

    # ---- timestep_embedding = cat([cos, sin]) -> time_embed MLP ----
    args = t * freqs_ref[...]                              # (T, 16)
    emb = jnp.concatenate([jnp.cos(args), jnp.sin(args)], axis=-1)   # (T, 32)
    h = _dot(emb, w1_ref[...]) + b1_ref[...]               # (T, 64), K=32 single dot
    h = jax.nn.silu(h)
    time_attr = _dot(h, w2_ref[...]) + b2_ref[...]         # (T, 64)

    # ---- intra_time_emb_layers (SiLU -> Linear) + atom_emb ----
    tp = _dot(jax.nn.silu(time_attr), w3_ref[...]) + b3_ref[...]     # (T, 32)
    rep = x3d + tp                                         # atom_3d_repr + time proj
    atom_repr = _dot(rep, wa_ref[...]) + ba_ref[...]       # (T, 32)

    # ---- coord2basis (matches torch: sqrt(radial) + EPS, sqrt(|cross|^2) + EPS) ----
    dx, dy, dz = ax - cx, ay - cy, az - cz
    radial = dx * dx + dy * dy + dz * dz
    norm = jnp.sqrt(radial) + EPSILON
    dx, dy, dz = dx / norm, dy / norm, dz / norm

    crx = ay * cz - az * cy
    cry = az * cx - ax * cz
    crz = ax * cy - ay * cx
    cross_norm = jnp.sqrt(crx * crx + cry * cry + crz * crz) + EPSILON
    crx, cry, crz = crx / cross_norm, cry / cross_norm, crz / cross_norm

    vx = dy * crz - dz * cry
    vy = dz * crx - dx * crz
    vz = dx * cry - dy * crx

    # coff = einsum('abc,ac->ab', edge_basis, r); only columns 0 (diff) and 2 (vertical)
    coff_i0 = dx * ax + dy * ay + dz * az
    coff_i2 = vx * ax + vy * ay + vz * az
    coff_j0 = dx * cx + dy * cy + dz * cz
    coff_j2 = vx * cx + vy * cy + vz * cz

    wf = wf_ref[...]                                       # (1, 32)
    two_pi = 2.0 * math.pi

    def gfp4(c0, c2):
        # GaussianFourierProjection = cat([sin, cos]) for each of coff[:,0], coff[:,2]
        p0 = c0 * wf * two_pi
        p2 = c2 * wf * two_pi
        return jnp.concatenate([jnp.sin(p0), jnp.cos(p0),
                                jnp.sin(p2), jnp.cos(p2)], axis=-1)   # (T, 128)

    embed_i = _dot(gfp4(coff_i0, coff_i2), wc_ref[...]) + bc_ref[...]  # (T, 32), K=128
    embed_j = _dot(gfp4(coff_j0, coff_j2), wc_ref[...]) + bc_ref[...]

    # project: Linear(2H, H) -> SiLU -> Linear(H, H); concat along lanes, one dot
    edge_in = jnp.concatenate([embed_i, embed_j], axis=-1)             # (T, 64)
    h1 = jax.nn.silu(_dot(edge_in, wp1_ref[...]) + bp1_ref[...])
    edge_attr = _dot(h1, wp2_ref[...]) + bp2_ref[...]                  # (T, 32)

    # single lane-dense 128-wide store per tile
    out_ref[...] = jnp.concatenate([time_attr, atom_repr, edge_attr], axis=-1)


# ---------------------------------------------------------------------------
# Wrapper (pallas_call plumbing)
# ---------------------------------------------------------------------------
def _full_spec(shape):
    nd = len(shape)
    return pl.BlockSpec(shape, lambda i, _nd=nd: (0,) * _nd)


def _choose_tile(n):
    # Large tiles amortize the ~0.35 us per-grid-step pipeline cost; keep
    # >= 2 grid steps so "parallel" can shard across v7x's 2 TensorCores.
    if n <= 16:
        return 8
    half = -(-n // 2)
    return max(8, min(512, -(-half // 8) * 8))


def fused_forward(x_feat, t_atom, pos_a, pos_c, params):
    n = x_feat.shape[0]
    tile = _choose_tile(n)
    n_blocks = -(-n // tile)
    n_pad = n_blocks * tile

    packed = jnp.concatenate(
        [x_feat, t_atom, pos_a, pos_c], axis=-1).astype(jnp.float32)   # (n, 39)
    if n_pad != n:
        packed = jnp.pad(packed, ((0, n_pad - n), (0, 0)))

    freqs = jnp.exp(-math.log(10000.0)
                    * jnp.arange(HALF, dtype=jnp.float32) / HALF).reshape(1, HALF)

    weight_keys = ("w1", "b1", "w2", "b2", "w3", "b3", "wa", "ba",
                   "wf", "wc", "bc", "wp1", "bp1", "wp2", "bp2")
    weights = [params[k] for k in weight_keys]

    ins = [packed, freqs] + weights
    in_specs = ([pl.BlockSpec((tile, PACK_W), lambda i: (i, 0)),
                 _full_spec(freqs.shape)]
                + [_full_spec(w.shape) for w in weights])

    flops_per_row = 2 * (32 * 64 + 64 * 64 + 64 * 32 + 32 * 32
                         + 2 * 128 * 32 + 64 * 32 + 32 * 32)
    cost = pl.CostEstimate(
        flops=flops_per_row * n_pad,
        transcendentals=512 * n_pad,
        bytes_accessed=4 * n_pad * (PACK_W + OUT_W) + sum(4 * int(w.size) for w in weights),
    )

    out = pl.pallas_call(
        _fused_kernel,
        grid=(n_blocks,),
        in_specs=in_specs,
        out_specs=pl.BlockSpec((tile, OUT_W), lambda i: (i, 0)),
        out_shape=jax.ShapeDtypeStruct((n_pad, OUT_W), jnp.float32),
        compiler_params=pltpu.CompilerParams(
            dimension_semantics=("parallel",)),
        cost_estimate=cost,
    )(*ins)

    out = out[:n]
    time_attr = out[:, :TIME_DIM]
    atom_repr = out[:, TIME_DIM:TIME_DIM + HID_DIM]
    edge_attr = out[:, TIME_DIM + HID_DIM:]
    return time_attr, atom_repr, edge_attr


def segment_mean(x, seg_ids, num_segments):
    s = jax.ops.segment_sum(x, seg_ids, num_segments=num_segments)
    cnt = jax.ops.segment_sum(jnp.ones((x.shape[0], 1), x.dtype), seg_ids,
                              num_segments=num_segments)
    return s / jnp.maximum(cnt, 1.0)


def assembleflow_get_output(x_feat, sampled_timestep_atom, position_t,
                            atom2molecule, num_molecules, params):
    # scatter-mean of positions only depends on raw inputs -> compute before kernel
    position_molecule = segment_mean(position_t, atom2molecule, num_molecules)

    # edge index: deterministic (molecule-center, atom) pairing
    # TODO(synk): radius() neighbor search not provided; use atom->own-molecule edges.
    pos_a = position_t                           # pos_intra gathered (identity gather)
    pos_c = position_molecule[atom2molecule]     # pos_center gathered

    # --- fused node + edge compute (single Pallas call) ---
    time_attr, atom_repr, edge_attr = fused_forward(
        x_feat, sampled_timestep_atom, pos_a, pos_c, params)

    # --- scatter-mean pooling of atom representations (glue) ---
    molecule_repr = segment_mean(atom_repr, atom2molecule, num_molecules)

    # TODO(synk): Velocity_Atom / Velocity_Molecule heads not provided; return
    # the computed representations instead of (velocity_translation, quaternion).
    return time_attr, atom_repr, molecule_repr, edge_attr


# ---------------------------------------------------------------------------
# Deterministic parameter construction (xavier_uniform weights, zero bias),
# stored (in_features, out_features) so kernels compute x @ W + b.
# ---------------------------------------------------------------------------
def _xavier(key, fan_in, fan_out):
    lim = math.sqrt(6.0 / (fan_in + fan_out))
    return jax.random.uniform(key, (fan_in, fan_out), jnp.float32, -lim, lim)


def make_params(key):
    ks = jax.random.split(key, 8)
    p = {}
    # time_embed: Linear(EMB, TIME) -> SiLU -> Linear(TIME, TIME)
    p["w1"] = _xavier(ks[0], EMB_DIM, TIME_DIM); p["b1"] = jnp.zeros((1, TIME_DIM), jnp.float32)
    p["w2"] = _xavier(ks[1], TIME_DIM, TIME_DIM); p["b2"] = jnp.zeros((1, TIME_DIM), jnp.float32)
    # intra_time_emb_layers: SiLU -> Linear(TIME, EMB)
    p["w3"] = _xavier(ks[2], TIME_DIM, EMB_DIM); p["b3"] = jnp.zeros((1, EMB_DIM), jnp.float32)
    # atom_emb: Linear(EMB, HID)
    p["wa"] = _xavier(ks[3], EMB_DIM, HID_DIM); p["ba"] = jnp.zeros((1, HID_DIM), jnp.float32)
    # GaussianFourierProjection W (non-trainable randn, scale=1)
    p["wf"] = jax.random.normal(ks[4], (1, HID_DIM), jnp.float32)
    # coff_mlp: Linear(4*HID, HID) over cat([sin(p0), cos(p0), sin(p2), cos(p2)])
    p["wc"] = _xavier(ks[5], 4 * HID_DIM, HID_DIM); p["bc"] = jnp.zeros((1, HID_DIM), jnp.float32)
    # project: Linear(2*HID, HID) -> SiLU -> Linear(HID, HID) over cat([embed_i, embed_j])
    p["wp1"] = _xavier(ks[6], 2 * HID_DIM, HID_DIM); p["bp1"] = jnp.zeros((1, HID_DIM), jnp.float32)
    p["wp2"] = _xavier(ks[7], HID_DIM, HID_DIM); p["bp2"] = jnp.zeros((1, HID_DIM), jnp.float32)
    return p


if __name__ == "__main__":
    key = jax.random.PRNGKey(0)
    k_par, k_x, k_pos, k_t = jax.random.split(key, 4)

    num_timesteps = 100
    num_cluster = 2
    mols_per_cluster = 2
    atoms_per_mol = 4
    num_molecules = num_cluster * mols_per_cluster            # 4
    num_atoms = num_molecules * atoms_per_mol                 # 16

    params = make_params(k_par)

    # x stands in for atom_3d_repr (PaiNN output); positions stand in for position_t.
    x_feat = jax.random.normal(k_x, (num_atoms, EMB_DIM), jnp.float32)
    position_t = jax.random.normal(k_pos, (num_atoms, 3), jnp.float32)

    atom2molecule = jnp.repeat(jnp.arange(num_molecules), atoms_per_mol)
    atom2cluster = jnp.repeat(jnp.arange(num_cluster), mols_per_cluster * atoms_per_mol)

    sampled_timestep = jax.random.randint(k_t, (num_cluster,), 0, num_timesteps)
    sampled_timestep = sampled_timestep.astype(jnp.float32) / num_timesteps * (1 - EPSILON) + EPSILON
    sampled_timestep_atom = sampled_timestep[atom2cluster][:, None]      # (N, 1)

    outs = assembleflow_get_output(x_feat, sampled_timestep_atom, position_t,
                                   atom2molecule, num_molecules, params)
    outs = jax.block_until_ready(outs)

    time_attr, atom_repr, molecule_repr, edge_attr = outs
    assert time_attr.shape == (num_atoms, TIME_DIM)
    assert atom_repr.shape == (num_atoms, HID_DIM)
    assert molecule_repr.shape == (num_molecules, HID_DIM)
    assert edge_attr.shape == (num_atoms, HID_DIM)
    assert all(bool(jnp.all(jnp.isfinite(o))) for o in outs)
    print("KERNEL_OK")
</pallas_src>

<mosaic_0001>
module attributes {stable_mosaic.version = 11 : i64} {
  func.func @_fused_kernel(%arg0: i32, %arg1: memref<8x39xf32, #tpu.memory_space<vmem>>, %arg2: memref<1x16xf32, #tpu.memory_space<vmem>>, %arg3: memref<32x64xf32, #tpu.memory_space<vmem>>, %arg4: memref<1x64xf32, #tpu.memory_space<vmem>>, %arg5: memref<64x64xf32, #tpu.memory_space<vmem>>, %arg6: memref<1x64xf32, #tpu.memory_space<vmem>>, %arg7: memref<64x32xf32, #tpu.memory_space<vmem>>, %arg8: memref<1x32xf32, #tpu.memory_space<vmem>>, %arg9: memref<32x32xf32, #tpu.memory_space<vmem>>, %arg10: memref<1x32xf32, #tpu.memory_space<vmem>>, %arg11: memref<1x32xf32, #tpu.memory_space<vmem>>, %arg12: memref<128x32xf32, #tpu.memory_space<vmem>>, %arg13: memref<1x32xf32, #tpu.memory_space<vmem>>, %arg14: memref<64x32xf32, #tpu.memory_space<vmem>>, %arg15: memref<1x32xf32, #tpu.memory_space<vmem>>, %arg16: memref<32x32xf32, #tpu.memory_space<vmem>>, %arg17: memref<1x32xf32, #tpu.memory_space<vmem>>, %arg18: memref<8x128xf32, #tpu.memory_space<vmem>>) attributes {dimension_semantics = [#tpu.dimension_semantics<parallel>], iteration_bounds = array<i64: 2>, scalar_prefetch = 0 : i64, scratch_operands = 0 : i64, tpu.core_type = #tpu.core_type<tc>, window_params = [{transform_indices = @transform_0, window_bounds = array<i64: 8, 39>}, {pipeline_mode = #tpu.pipeline_mode<synchronous>, transform_indices = @transform_1, window_bounds = array<i64: 1, 16>}, {pipeline_mode = #tpu.pipeline_mode<synchronous>, transform_indices = @transform_2, window_bounds = array<i64: 32, 64>}, {pipeline_mode = #tpu.pipeline_mode<synchronous>, transform_indices = @transform_3, window_bounds = array<i64: 1, 64>}, {pipeline_mode = #tpu.pipeline_mode<synchronous>, transform_indices = @transform_4, window_bounds = array<i64: 64, 64>}, {pipeline_mode = #tpu.pipeline_mode<synchronous>, transform_indices = @transform_5, window_bounds = array<i64: 1, 64>}, {pipeline_mode = #tpu.pipeline_mode<synchronous>, transform_indices = @transform_6, window_bounds = array<i64: 64, 32>}, {pipeline_mode = #tpu.pipeline_mode<synchronous>, transform_indices = @transform_7, window_bounds = array<i64: 1, 32>}, {pipeline_mode = #tpu.pipeline_mode<synchronous>, transform_indices = @transform_8, window_bounds = array<i64: 32, 32>}, {pipeline_mode = #tpu.pipeline_mode<synchronous>, transform_indices = @transform_9, window_bounds = array<i64: 1, 32>}, {pipeline_mode = #tpu.pipeline_mode<synchronous>, transform_indices = @transform_10, window_bounds = array<i64: 1, 32>}, {pipeline_mode = #tpu.pipeline_mode<synchronous>, transform_indices = @transform_11, window_bounds = array<i64: 128, 32>}, {pipeline_mode = #tpu.pipeline_mode<synchronous>, transform_indices = @transform_12, window_bounds = array<i64: 1, 32>}, {pipeline_mode = #tpu.pipeline_mode<synchronous>, transform_indices = @transform_13, window_bounds = array<i64: 64, 32>}, {pipeline_mode = #tpu.pipeline_mode<synchronous>, transform_indices = @transform_14, window_bounds = array<i64: 1, 32>}, {pipeline_mode = #tpu.pipeline_mode<synchronous>, transform_indices = @transform_15, window_bounds = array<i64: 32, 32>}, {pipeline_mode = #tpu.pipeline_mode<synchronous>, transform_indices = @transform_16, window_bounds = array<i64: 1, 32>}, {transform_indices = @transform_17, window_bounds = array<i64: 8, 128>}]} {
    %c0 = arith.constant 0 : index
    %c0_0 = arith.constant 0 : index
    %0 = vector.load %arg1[%c0, %c0_0] : memref<8x39xf32, #tpu.memory_space<vmem>>, vector<8x39xf32>
    %1 = vector.extract_strided_slice %0 {offsets = [0, 0], sizes = [8, 32], strides = [1, 1]} : vector<8x39xf32> to vector<8x32xf32>
    %2 = vector.extract_strided_slice %0 {offsets = [0, 32], sizes = [8, 1], strides = [1, 1]} : vector<8x39xf32> to vector<8x1xf32>
    %3 = vector.extract_strided_slice %0 {offsets = [0, 33], sizes = [8, 1], strides = [1, 1]} : vector<8x39xf32> to vector<8x1xf32>
    %4 = vector.extract_strided_slice %0 {offsets = [0, 34], sizes = [8, 1], strides = [1, 1]} : vector<8x39xf32> to vector<8x1xf32>
    %5 = vector.extract_strided_slice %0 {offsets = [0, 35], sizes = [8, 1], strides = [1, 1]} : vector<8x39xf32> to vector<8x1xf32>
    %6 = vector.extract_strided_slice %0 {offsets = [0, 36], sizes = [8, 1], strides = [1, 1]} : vector<8x39xf32> to vector<8x1xf32>
    %7 = vector.extract_strided_slice %0 {offsets = [0, 37], sizes = [8, 1], strides = [1, 1]} : vector<8x39xf32> to vector<8x1xf32>
    %8 = vector.extract_strided_slice %0 {offsets = [0, 38], sizes = [8, 1], strides = [1, 1]} : vector<8x39xf32> to vector<8x1xf32>
    %c0_1 = arith.constant 0 : index
    %c0_2 = arith.constant 0 : index
    %9 = vector.load %arg2[%c0_1, %c0_2] : memref<1x16xf32, #tpu.memory_space<vmem>>, vector<1x16xf32>
    %10 = vector.broadcast %2 : vector<8x1xf32> to vector<8x16xf32>
    %11 = vector.broadcast %9 : vector<1x16xf32> to vector<8x16xf32>
    %12 = arith.mulf %10, %11 : vector<8x16xf32>
    %13 = math.cos %12 : vector<8x16xf32>
    %14 = math.sin %12 : vector<8x16xf32>
    %15 = tpu.concatenate %13, %14 in 1 : vector<8x16xf32>, vector<8x16xf32> -> vector<8x32xf32>
    %c0_3 = arith.constant 0 : index
    %c0_4 = arith.constant 0 : index
    %16 = vector.load %arg3[%c0_3, %c0_4] : memref<32x64xf32, #tpu.memory_space<vmem>>, vector<32x64xf32>
    %17 = arith.truncf %15 : vector<8x32xf32> to vector<8x32xbf16>
    %18 = arith.truncf %16 : vector<32x64xf32> to vector<32x64xbf16>
    %cst = arith.constant dense<0.000000e+00> : vector<8x64xf32>
    %19 = tpu.matmul %17, %18, %cst {dimension_numbers = #tpu.dot_dimension_numbers<[1], [0], [0], [1], [0, 0, 1, 1], [], []>} : vector<8x32xbf16>, vector<32x64xbf16>, vector<8x64xf32> -> vector<8x64xf32>
    %c0_5 = arith.constant 0 : index
    %c0_6 = arith.constant 0 : index
    %20 = vector.load %arg4[%c0_5, %c0_6] : memref<1x64xf32, #tpu.memory_space<vmem>>, vector<1x64xf32>
    %21 = vector.broadcast %20 : vector<1x64xf32> to vector<8x64xf32>
    %22 = arith.addf %19, %21 : vector<8x64xf32>
    %23 = arith.negf %22 : vector<8x64xf32>
    %24 = math.exp %23 : vector<8x64xf32>
    %cst_7 = arith.constant 1.000000e+00 : f32
    %25 = vector.broadcast %cst_7 : f32 to vector<8x64xf32>
    %26 = arith.addf %25, %24 : vector<8x64xf32>
    %27 = arith.divf %25, %26 : vector<8x64xf32>
    %28 = arith.mulf %22, %27 : vector<8x64xf32>
    %c0_8 = arith.constant 0 : index
    %c0_9 = arith.constant 0 : index
    %29 = vector.load %arg5[%c0_8, %c0_9] : memref<64x64xf32, #tpu.memory_space<vmem>>, vector<64x64xf32>
    %30 = arith.truncf %28 : vector<8x64xf32> to vector<8x64xbf16>
    %31 = arith.truncf %29 : vector<64x64xf32> to vector<64x64xbf16>
    %cst_10 = arith.constant dense<0.000000e+00> : vector<8x64xf32>
    %32 = tpu.matmul %30, %31, %cst_10 {dimension_numbers = #tpu.dot_dimension_numbers<[1], [0], [0], [1], [0, 0, 1, 1], [], []>} : vector<8x64xbf16>, vector<64x64xbf16>, vector<8x64xf32> -> vector<8x64xf32>
    %c0_11 = arith.constant 0 : index
    %c0_12 = arith.constant 0 : index
    %33 = vector.load %arg6[%c0_11, %c0_12] : memref<1x64xf32, #tpu.memory_space<vmem>>, vector<1x64xf32>
    %34 = vector.broadcast %33 : vector<1x64xf32> to vector<8x64xf32>
    %35 = arith.addf %32, %34 : vector<8x64xf32>
    %36 = arith.negf %35 : vector<8x64xf32>
    %37 = math.exp %36 : vector<8x64xf32>
    %cst_13 = arith.constant 1.000000e+00 : f32
    %38 = vector.broadcast %cst_13 : f32 to vector<8x64xf32>
    %39 = arith.addf %38, %37 : vector<8x64xf32>
    %40 = arith.divf %38, %39 : vector<8x64xf32>
    %41 = arith.mulf %35, %40 : vector<8x64xf32>
    %c0_14 = arith.constant 0 : index
    %c0_15 = arith.constant 0 : index
    %42 = vector.load %arg7[%c0_14, %c0_15] : memref<64x32xf32, #tpu.memory_space<vmem>>, vector<64x32xf32>
    %43 = arith.truncf %41 : vector<8x64xf32> to vector<8x64xbf16>
    %44 = arith.truncf %42 : vector<64x32xf32> to vector<64x32xbf16>
    %cst_16 = arith.constant dense<0.000000e+00> : vector<8x32xf32>
    %45 = tpu.matmul %43, %44, %cst_16 {dimension_numbers = #tpu.dot_dimension_numbers<[1], [0], [0], [1], [0, 0, 1, 1], [], []>} : vector<8x64xbf16>, vector<64x32xbf16>, vector<8x32xf32> -> vector<8x32xf32>
    %c0_17 = arith.constant 0 : index
    %c0_18 = arith.constant 0 : index
    %46 = vector.load %arg8[%c0_17, %c0_18] : memref<1x32xf32, #tpu.memory_space<vmem>>, vector<1x32xf32>
    %47 = vector.broadcast %46 : vector<1x32xf32> to vector<8x32xf32>
    %48 = arith.addf %45, %47 : vector<8x32xf32>
    %49 = arith.addf %1, %48 : vector<8x32xf32>
    %c0_19 = arith.constant 0 : index
    %c0_20 = arith.constant 0 : index
    %50 = vector.load %arg9[%c0_19, %c0_20] : memref<32x32xf32, #tpu.memory_space<vmem>>, vector<32x32xf32>
    %51 = arith.truncf %49 : vector<8x32xf32> to vector<8x32xbf16>
    %52 = arith.truncf %50 : vector<32x32xf32> to vector<32x32xbf16>
    %cst_21 = arith.constant dense<0.000000e+00> : vector<8x32xf32>
    %53 = tpu.matmul %51, %52, %cst_21 {dimension_numbers = #tpu.dot_dimension_numbers<[1], [0], [0], [1], [0, 0, 1, 1], [], []>} : vector<8x32xbf16>, vector<32x32xbf16>, vector<8x32xf32> -> vector<8x32xf32>
    %c0_22 = arith.constant 0 : index
    %c0_23 = arith.constant 0 : index
    %54 = vector.load %arg10[%c0_22, %c0_23] : memref<1x32xf32, #tpu.memory_space<vmem>>, vector<1x32xf32>
    %55 = vector.broadcast %54 : vector<1x32xf32> to vector<8x32xf32>
    %56 = arith.addf %53, %55 : vector<8x32xf32>
    %57 = arith.subf %3, %6 : vector<8x1xf32>
    %58 = arith.subf %4, %7 : vector<8x1xf32>
    %59 = arith.subf %5, %8 : vector<8x1xf32>
    %60 = arith.mulf %57, %57 : vector<8x1xf32>
    %61 = arith.mulf %58, %58 : vector<8x1xf32>
    %62 = arith.addf %60, %61 : vector<8x1xf32>
    %63 = arith.mulf %59, %59 : vector<8x1xf32>
    %64 = arith.addf %62, %63 : vector<8x1xf32>
    %65 = math.sqrt %64 : vector<8x1xf32>
    %cst_24 = arith.constant 9.99999993E-9 : f32
    %66 = vector.broadcast %cst_24 : f32 to vector<8x1xf32>
    %67 = arith.addf %65, %66 : vector<8x1xf32>
    %68 = arith.divf %57, %67 : vector<8x1xf32>
    %69 = arith.divf %58, %67 : vector<8x1xf32>
    %70 = arith.divf %59, %67 : vector<8x1xf32>
    %71 = arith.mulf %4, %8 : vector<8x1xf32>
    %72 = arith.mulf %5, %7 : vector<8x1xf32>
    %73 = arith.subf %71, %72 : vector<8x1xf32>
    %74 = arith.mulf %5, %6 : vector<8x1xf32>
    %75 = arith.mulf %3, %8 : vector<8x1xf32>
    %76 = arith.subf %74, %75 : vector<8x1xf32>
    %77 = arith.mulf %3, %7 : vector<8x1xf32>
    %78 = arith.mulf %4, %6 : vector<8x1xf32>
    %79 = arith.subf %77, %78 : vector<8x1xf32>
    %80 = arith.mulf %73, %73 : vector<8x1xf32>
    %81 = arith.mulf %76, %76 : vector<8x1xf32>
    %82 = arith.addf %80, %81 : vector<8x1xf32>
    %83 = arith.mulf %79, %79 : vector<8x1xf32>
    %84 = arith.addf %82, %83 : vector<8x1xf32>
    %85 = math.sqrt %84 : vector<8x1xf32>
    %cst_25 = arith.constant 9.99999993E-9 : f32
    %86 = vector.broadcast %cst_25 : f32 to vector<8x1xf32>
    %87 = arith.addf %85, %86 : vector<8x1xf32>
    %88 = arith.divf %73, %87 : vector<8x1xf32>
    %89 = arith.divf %76, %87 : vector<8x1xf32>
    %90 = arith.divf %79, %87 : vector<8x1xf32>
    %91 = arith.mulf %69, %90 : vector<8x1xf32>
    %92 = arith.mulf %70, %89 : vector<8x1xf32>
    %93 = arith.subf %91, %92 : vector<8x1xf32>
    %94 = arith.mulf %70, %88 : vector<8x1xf32>
    %95 = arith.mulf %68, %90 : vector<8x1xf32>
    %96 = arith.subf %94, %95 : vector<8x1xf32>
    %97 = arith.mulf %68, %89 : vector<8x1xf32>
    %98 = arith.mulf %69, %88 : vector<8x1xf32>
    %99 = arith.subf %97, %98 : vector<8x1xf32>
    %100 = arith.mulf %68, %3 : vector<8x1xf32>
    %101 = arith.mulf %69, %4 : vector<8x1xf32>
    %102 = arith.addf %100, %101 : vector<8x1xf32>
    %103 = arith.mulf %70, %5 : vector<8x1xf32>
    %104 = arith.addf %102, %103 : vector<8x1xf32>
    %105 = arith.mulf %93, %3 : vector<8x1xf32>
    %106 = arith.mulf %96, %4 : vector<8x1xf32>
    %107 = arith.addf %105, %106 : vector<8x1xf32>
    %108 = arith.mulf %99, %5 : vector<8x1xf32>
    %109 = arith.addf %107, %108 : vector<8x1xf32>
    %110 = arith.mulf %68, %6 : vector<8x1xf32>
    %111 = arith.mulf %69, %7 : vector<8x1xf32>
    %112 = arith.addf %110, %111 : vector<8x1xf32>
    %113 = arith.mulf %70, %8 : vector<8x1xf32>
    %114 = arith.addf %112, %113 : vector<8x1xf32>
    %115 = arith.mulf %93, %6 : vector<8x1xf32>
    %116 = arith.mulf %96, %7 : vector<8x1xf32>
    %117 = arith.addf %115, %116 : vector<8x1xf32>
    %118 = arith.mulf %99, %8 : vector<8x1xf32>
    %119 = arith.addf %117, %118 : vector<8x1xf32>
    %c0_26 = arith.constant 0 : index
    %c0_27 = arith.constant 0 : index
    %120 = vector.load %arg11[%c0_26, %c0_27] : memref<1x32xf32, #tpu.memory_space<vmem>>, vector<1x32xf32>
    %121 = vector.broadcast %104 : vector<8x1xf32> to vector<8x32xf32>
    %122 = vector.broadcast %120 : vector<1x32xf32> to vector<8x32xf32>
    %123 = arith.mulf %121, %122 : vector<8x32xf32>
    %cst_28 = arith.constant 6.28318548 : f32
    %124 = vector.broadcast %cst_28 : f32 to vector<8x32xf32>
    %125 = arith.mulf %123, %124 : vector<8x32xf32>
    %126 = vector.broadcast %109 : vector<8x1xf32> to vector<8x32xf32>
    %127 = vector.broadcast %120 : vector<1x32xf32> to vector<8x32xf32>
    %128 = arith.mulf %126, %127 : vector<8x32xf32>
    %cst_29 = arith.constant 6.28318548 : f32
    %129 = vector.broadcast %cst_29 : f32 to vector<8x32xf32>
    %130 = arith.mulf %128, %129 : vector<8x32xf32>
    %131 = math.sin %125 : vector<8x32xf32>
    %132 = math.cos %125 : vector<8x32xf32>
    %133 = math.sin %130 : vector<8x32xf32>
    %134 = math.cos %130 : vector<8x32xf32>
    %135 = tpu.concatenate %131, %132, %133, %134 in 1 : vector<8x32xf32>, vector<8x32xf32>, vector<8x32xf32>, vector<8x32xf32> -> vector<8x128xf32>
    %c0_30 = arith.constant 0 : index
    %c0_31 = arith.constant 0 : index
    %136 = vector.load %arg12[%c0_30, %c0_31] : memref<128x32xf32, #tpu.memory_space<vmem>>, vector<128x32xf32>
    %137 = arith.truncf %135 : vector<8x128xf32> to vector<8x128xbf16>
    %138 = arith.truncf %136 : vector<128x32xf32> to vector<128x32xbf16>
    %cst_32 = arith.constant dense<0.000000e+00> : vector<8x32xf32>
    %139 = tpu.matmul %137, %138, %cst_32 {dimension_numbers = #tpu.dot_dimension_numbers<[1], [0], [0], [1], [0, 0, 1, 1], [], []>} : vector<8x128xbf16>, vector<128x32xbf16>, vector<8x32xf32> -> vector<8x32xf32>
    %c0_33 = arith.constant 0 : index
    %c0_34 = arith.constant 0 : index
    %140 = vector.load %arg13[%c0_33, %c0_34] : memref<1x32xf32, #tpu.memory_space<vmem>>, vector<1x32xf32>
    %141 = vector.broadcast %140 : vector<1x32xf32> to vector<8x32xf32>
    %142 = arith.addf %139, %141 : vector<8x32xf32>
    %143 = vector.broadcast %114 : vector<8x1xf32> to vector<8x32xf32>
    %144 = vector.broadcast %120 : vector<1x32xf32> to vector<8x32xf32>
    %145 = arith.mulf %143, %144 : vector<8x32xf32>
    %cst_35 = arith.constant 6.28318548 : f32
    %146 = vector.broadcast %cst_35 : f32 to vector<8x32xf32>
    %147 = arith.mulf %145, %146 : vector<8x32xf32>
    %148 = vector.broadcast %119 : vector<8x1xf32> to vector<8x32xf32>
    %149 = vector.broadcast %120 : vector<1x32xf32> to vector<8x32xf32>
    %150 = arith.mulf %148, %149 : vector<8x32xf32>
    %cst_36 = arith.constant 6.28318548 : f32
    %151 = vector.broadcast %cst_36 : f32 to vector<8x32xf32>
    %152 = arith.mulf %150, %151 : vector<8x32xf32>
    %153 = math.sin %147 : vector<8x32xf32>
    %154 = math.cos %147 : vector<8x32xf32>
    %155 = math.sin %152 : vector<8x32xf32>
    %156 = math.cos %152 : vector<8x32xf32>
    %157 = tpu.concatenate %153, %154, %155, %156 in 1 : vector<8x32xf32>, vector<8x32xf32>, vector<8x32xf32>, vector<8x32xf32> -> vector<8x128xf32>
    %c0_37 = arith.constant 0 : index
    %c0_38 = arith.constant 0 : index
    %158 = vector.load %arg12[%c0_37, %c0_38] : memref<128x32xf32, #tpu.memory_space<vmem>>, vector<128x32xf32>
    %159 = arith.truncf %157 : vector<8x128xf32> to vector<8x128xbf16>
    %160 = arith.truncf %158 : vector<128x32xf32> to vector<128x32xbf16>
    %cst_39 = arith.constant dense<0.000000e+00> : vector<8x32xf32>
    %161 = tpu.matmul %159, %160, %cst_39 {dimension_numbers = #tpu.dot_dimension_numbers<[1], [0], [0], [1], [0, 0, 1, 1], [], []>} : vector<8x128xbf16>, vector<128x32xbf16>, vector<8x32xf32> -> vector<8x32xf32>
    %c0_40 = arith.constant 0 : index
    %c0_41 = arith.constant 0 : index
    %162 = vector.load %arg13[%c0_40, %c0_41] : memref<1x32xf32, #tpu.memory_space<vmem>>, vector<1x32xf32>
    %163 = vector.broadcast %162 : vector<1x32xf32> to vector<8x32xf32>
    %164 = arith.addf %161, %163 : vector<8x32xf32>
    %165 = tpu.concatenate %142, %164 in 1 : vector<8x32xf32>, vector<8x32xf32> -> vector<8x64xf32>
    %c0_42 = arith.constant 0 : index
    %c0_43 = arith.constant 0 : index
    %166 = vector.load %arg14[%c0_42, %c0_43] : memref<64x32xf32, #tpu.memory_space<vmem>>, vector<64x32xf32>
    %167 = arith.truncf %165 : vector<8x64xf32> to vector<8x64xbf16>
    %168 = arith.truncf %166 : vector<64x32xf32> to vector<64x32xbf16>
    %cst_44 = arith.constant dense<0.000000e+00> : vector<8x32xf32>
    %169 = tpu.matmul %167, %168, %cst_44 {dimension_numbers = #tpu.dot_dimension_numbers<[1], [0], [0], [1], [0, 0, 1, 1], [], []>} : vector<8x64xbf16>, vector<64x32xbf16>, vector<8x32xf32> -> vector<8x32xf32>
    %c0_45 = arith.constant 0 : index
    %c0_46 = arith.constant 0 : index
    %170 = vector.load %arg15[%c0_45, %c0_46] : memref<1x32xf32, #tpu.memory_space<vmem>>, vector<1x32xf32>
    %171 = vector.broadcast %170 : vector<1x32xf32> to vector<8x32xf32>
    %172 = arith.addf %169, %171 : vector<8x32xf32>
    %173 = arith.negf %172 : vector<8x32xf32>
    %174 = math.exp %173 : vector<8x32xf32>
    %cst_47 = arith.constant 1.000000e+00 : f32
    %175 = vector.broadcast %cst_47 : f32 to vector<8x32xf32>
    %176 = arith.addf %175, %174 : vector<8x32xf32>
    %177 = arith.divf %175, %176 : vector<8x32xf32>
    %178 = arith.mulf %172, %177 : vector<8x32xf32>
    %c0_48 = arith.constant 0 : index
    %c0_49 = arith.constant 0 : index
    %179 = vector.load %arg16[%c0_48, %c0_49] : memref<32x32xf32, #tpu.memory_space<vmem>>, vector<32x32xf32>
    %180 = arith.truncf %178 : vector<8x32xf32> to vector<8x32xbf16>
    %181 = arith.truncf %179 : vector<32x32xf32> to vector<32x32xbf16>
    %cst_50 = arith.constant dense<0.000000e+00> : vector<8x32xf32>
    %182 = tpu.matmul %180, %181, %cst_50 {dimension_numbers = #tpu.dot_dimension_numbers<[1], [0], [0], [1], [0, 0, 1, 1], [], []>} : vector<8x32xbf16>, vector<32x32xbf16>, vector<8x32xf32> -> vector<8x32xf32>
    %c0_51 = arith.constant 0 : index
    %c0_52 = arith.constant 0 : index
    %183 = vector.load %arg17[%c0_51, %c0_52] : memref<1x32xf32, #tpu.memory_space<vmem>>, vector<1x32xf32>
    %184 = vector.broadcast %183 : vector<1x32xf32> to vector<8x32xf32>
    %185 = arith.addf %182, %184 : vector<8x32xf32>
    %186 = tpu.concatenate %35, %56, %185 in 1 : vector<8x64xf32>, vector<8x32xf32>, vector<8x32xf32> -> vector<8x128xf32>
    %c0_53 = arith.constant 0 : index
    %c0_54 = arith.constant 0 : index
    %187 = vector.load %arg18[%c0_53, %c0_54] : memref<8x128xf32, #tpu.memory_space<vmem>>, vector<8x128xf32>
    tpu.vector_store %arg18[%c0_53, %c0_54], %186 {strides = array<i32>} : memref<8x128xf32, #tpu.memory_space<vmem>>, vector<8x128xf32>,
    return
  }
  func.func @transform_0(%arg0: i32) -> (i32, i32) {
    %c0_i32 = arith.constant 0 : i32
    %c0_i32_0 = arith.constant 0 : i32
    return %arg0, %c0_i32 : i32, i32
  }
  func.func @transform_1(%arg0: i32) -> (i32, i32) {
    %c0_i32 = arith.constant 0 : i32
    %c0_i32_0 = arith.constant 0 : i32
    %c0_i32_1 = arith.constant 0 : i32
    return %c0_i32, %c0_i32_0 : i32, i32
  }
  func.func @transform_2(%arg0: i32) -> (i32, i32) {
    %c0_i32 = arith.constant 0 : i32
    %c0_i32_0 = arith.constant 0 : i32
    %c0_i32_1 = arith.constant 0 : i32
    return %c0_i32, %c0_i32_0 : i32, i32
  }
  func.func @transform_3(%arg0: i32) -> (i32, i32) {
    %c0_i32 = arith.constant 0 : i32
    %c0_i32_0 = arith.constant 0 : i32
    %c0_i32_1 = arith.constant 0 : i32
    return %c0_i32, %c0_i32_0 : i32, i32
  }
  func.func @transform_4(%arg0: i32) -> (i32, i32) {
    %c0_i32 = arith.constant 0 : i32
    %c0_i32_0 = arith.constant 0 : i32
    %c0_i32_1 = arith.constant 0 : i32
    return %c0_i32, %c0_i32_0 : i32, i32
  }
  func.func @transform_5(%arg0: i32) -> (i32, i32) {
    %c0_i32 = arith.constant 0 : i32
    %c0_i32_0 = arith.constant 0 : i32
    %c0_i32_1 = arith.constant 0 : i32
    return %c0_i32, %c0_i32_0 : i32, i32
  }
  func.func @transform_6(%arg0: i32) -> (i32, i32) {
    %c0_i32 = arith.constant 0 : i32
    %c0_i32_0 = arith.constant 0 : i32
    %c0_i32_1 = arith.constant 0 : i32
    return %c0_i32, %c0_i32_0 : i32, i32
  }
  func.func @transform_7(%arg0: i32) -> (i32, i32) {
    %c0_i32 = arith.constant 0 : i32
    %c0_i32_0 = arith.constant 0 : i32
    %c0_i32_1 = arith.constant 0 : i32
    return %c0_i32, %c0_i32_0 : i32, i32
  }
  func.func @transform_8(%arg0: i32) -> (i32, i32) {
    %c0_i32 = arith.constant 0 : i32
    %c0_i32_0 = arith.constant 0 : i32
    %c0_i32_1 = arith.constant 0 : i32
    return %c0_i32, %c0_i32_0 : i32, i32
  }
  func.func @transform_9(%arg0: i32) -> (i32, i32) {
    %c0_i32 = arith.constant 0 : i32
    %c0_i32_0 = arith.constant 0 : i32
    %c0_i32_1 = arith.constant 0 : i32
    return %c0_i32, %c0_i32_0 : i32, i32
  }
  func.func @transform_10(%arg0: i32) -> (i32, i32) {
    %c0_i32 = arith.constant 0 : i32
    %c0_i32_0 = arith.constant 0 : i32
    %c0_i32_1 = arith.constant 0 : i32
    return %c0_i32, %c0_i32_0 : i32, i32
  }
  func.func @transform_11(%arg0: i32) -> (i32, i32) {
    %c0_i32 = arith.constant 0 : i32
    %c0_i32_0 = arith.constant 0 : i32
    %c0_i32_1 = arith.constant 0 : i32
    return %c0_i32, %c0_i32_0 : i32, i32
  }
  func.func @transform_12(%arg0: i32) -> (i32, i32) {
    %c0_i32 = arith.constant 0 : i32
    %c0_i32_0 = arith.constant 0 : i32
    %c0_i32_1 = arith.constant 0 : i32
    return %c0_i32, %c0_i32_0 : i32, i32
  }
  func.func @transform_13(%arg0: i32) -> (i32, i32) {
    %c0_i32 = arith.constant 0 : i32
    %c0_i32_0 = arith.constant 0 : i32
    %c0_i32_1 = arith.constant 0 : i32
    return %c0_i32, %c0_i32_0 : i32, i32
  }
  func.func @transform_14(%arg0: i32) -> (i32, i32) {
    %c0_i32 = arith.constant 0 : i32
    %c0_i32_0 = arith.constant 0 : i32
    %c0_i32_1 = arith.constant 0 : i32
    return %c0_i32, %c0_i32_0 : i32, i32
  }
  func.func @transform_15(%arg0: i32) -> (i32, i32) {
    %c0_i32 = arith.constant 0 : i32
    %c0_i32_0 = arith.constant 0 : i32
    %c0_i32_1 = arith.constant 0 : i32
    return %c0_i32, %c0_i32_0 : i32, i32
  }
  func.func @transform_16(%arg0: i32) -> (i32, i32) {
    %c0_i32 = arith.constant 0 : i32
    %c0_i32_0 = arith.constant 0 : i32
    %c0_i32_1 = arith.constant 0 : i32
    return %c0_i32, %c0_i32_0 : i32, i32
  }
  func.func @transform_17(%arg0: i32) -> (i32, i32) {
    %c0_i32 = arith.constant 0 : i32
    %c0_i32_0 = arith.constant 0 : i32
    return %arg0, %c0_i32 : i32, i32
  }
}

</mosaic_0001>

<bundles_post_ra>
// kernel: tpu_custom_call.1
= control target key start
LH: loop header
LB: loop body
LE: loop exit
PB: predicated region body
PF: predicated region fallthrough
CT: control target
= control target key end

     0   :  { %s3769_s0 = inlined_call_operand.vmem [shape: f32[16,39], index: 0, kind: input, shape index: {}]   ;;  %s3770_s1 = inlined_call_operand.vmem [shape: f32[1,16], index: 1, kind: input, shape index: {}]   ;;  %s3771_s2 = inlined_call_operand.vmem [shape: f32[32,64], index: 2, kind: input, shape index: {}]   ;;  %s3772_s3 = inlined_call_operand.vmem [shape: f32[1,64], index: 3, kind: input, shape index: {}]   ;;  %s3773_s4 = inlined_call_operand.vmem [shape: f32[64,64], index: 4, kind: input, shape index: {}]   ;;  %s3774_s5 = inlined_call_operand.vmem [shape: f32[1,64], index: 5, kind: input, shape index: {}]   ;;  %s3775_s6 = inlined_call_operand.vmem [shape: f32[64,32], index: 6, kind: input, shape index: {}]   ;;  %s3776_s7 = inlined_call_operand.vmem [shape: f32[1,32], index: 7, kind: input, shape index: {}]   ;;  %s3777_s8 = inlined_call_operand.vmem [shape: f32[32,32], index: 8, kind: input, shape index: {}]   ;;  %s3778_s9 = inlined_call_operand.vmem [shape: f32[1,32], index: 9, kind: input, shape index: {}]   ;;  %s3779_s10 = inlined_call_operand.vmem [shape: f32[1,32], index: 10, kind: input, shape index: {}]   ;;  %s3780_s11 = inlined_call_operand.vmem [shape: f32[128,32], index: 11, kind: input, shape index: {}]   ;;  %s3781_s12 = inlined_call_operand.vmem [shape: f32[1,32], index: 12, kind: input, shape index: {}]   ;;  %s3782_s13 = inlined_call_operand.vmem [shape: f32[64,32], index: 13, kind: input, shape index: {}]   ;;  %s3783_s14 = inlined_call_operand.vmem [shape: f32[1,32], index: 14, kind: input, shape index: {}]   ;;  %s3784_s15 = inlined_call_operand.vmem [shape: f32[32,32], index: 15, kind: input, shape index: {}]   ;;  %s3785_s16 = inlined_call_operand.vmem [shape: f32[1,32], index: 16, kind: input, shape index: {}]   ;;  %s3786_s17 = inlined_call_operand.hbm [shape: f32[16,128], index: 17, kind: output, shape index: {}]  }
   0x1   :  { %3796 = sst [smem:[#allocation8_spill]] %s3769_s0 }
   0x2   :  { %3797 = sst [smem:[#allocation9_spill]] %s3770_s1 }
   0x3   :  { %3798 = sst [smem:[#allocation10_spill]] %s3771_s2 }
   0x4   :  { %3799 = sst [smem:[#allocation11_spill]] %s3772_s3 }
   0x5   :  { %3800 = sst [smem:[#allocation12_spill]] %s3773_s4 }
   0x6   :  { %22 = vsyncpa [#allocation3], 0 }
   0x7   :  { %24 = vsyncpa [#allocation3 + $0x1], 0  ;;  %s2954_s24 = smov 0   ;;  %s2956_s25 = smov 0  }
   0x8   :  { %s2958_s26 = smov 0   ;;  %s2960_s27 = smov 0  }
   0x9 LB: > { %3801 = sst [smem:[#allocation5_spill]] %s2835_s26  ;;  %s2975_s28 = sadd.s32 4294967295, %s2839_s27   ;;  %s2839_s27 = sphi %s2960_s27, %s3820_s27   ;;  %s2835_s26 = sphi %s2958_s26, %s3822_s26   ;;  %s2831_s25 = sphi %s2956_s25, %s3824_s25   ;;  %s2827_s24 = sphi %s2954_s24, %s3823_s24  }
   0xa   : > { %s2434_s29 = sadd.s32 4294967294, %s2839_s27   ;;  %s2979_s0 = sadd.s32 1, %s2839_s27  }
   0xb   : > { %3802 = sst [smem:[#allocation6_spill]] %s2979_s0  ;;  %s399_s30 = sadd.s32 1, %s2835_s26 }
   0xc   : > { %s396_s18 = ssub.s32 %s2839_s27, %s2979_s0  ;;  %p409_p0 = scmp.ne.s32.totalorder %s2835_s26, %s2831_s25 }
   0xd   : > { %p397_p1 = scmp.eq.s32.totalorder %s396_s18, 0  ;;  %p410_p2 = scmp.eq.s32.totalorder %s2975_s28, 1 }
   0xe   : > { %p415_p3 = scmp.ne.s32.totalorder %s2831_s25, %s2827_s24  ;;  %p416_p4 = scmp.eq.s32.totalorder %s2434_s29, 1 }
   0xf   : > { %s2990_s19 = scalar_select %p397_p1, %s2835_s26, %s399_s30  }
  0x10   : > { %p2992_p5 = por %p410_p2, %p409_p0  ;;  %p2996_p6 = por %p416_p4, %p415_p3 }
  0x11   : > { %3803 = sst [smem:[#allocation7_spill]] %s2990_s19  ;;  %p2437_p7 = scmp.ge.s32.totalorder %s2839_s27, 1 }
  0x12   : > { %p489_p8 = scmp.lt.s32.totalorder %s2839_s27, 3 }
  0x14   : > { %p490_p9 = pnand %p2437_p7, %p489_p8 }
  0x15   : > { %p540_p10 = scmp.lt.s32.totalorder (!%p490_p9), %s2975_s28, 1  ;;  %s3806_s30 = sld [smem:[#allocation8_spill]] (!%p490_p9) }
  0x16   : > { %493 = sbr.rel (%p490_p9) target bundleno = 2094 (0x82e), region = 88  ;;  %s2842_s19 = smov (!%p490_p9), 123  }
  0x17   : > { %s3790_s26 = smov (!%p490_p9), 126   ;;  %s2844_s0 = smov (!%p490_p9), 124  }
  0x18   : > { %s3807_s2 = sld [smem:[#allocation10_spill]] (!%p490_p9)  ;;  %s3810_s23 = smov (!%p490_p9), 127  }
  0x19   : > { %s3809_s4 = sld [smem:[#allocation12_spill]] (!%p490_p9)  ;;  %s3811_s29 = smov (!%p490_p9), 1  }
  0x1a   : > { %s3812_s3 = sld [smem:[#allocation11_spill]] (!%p490_p9) }
  0x1b   : > { %v2841_v0 = vmov 32   ;;  %s541_s21 = scalar_select %p540_p10, %s2975_s28, 1  ;;  %v2846_v4 = vmov 0.0   ;;  %v2847_v19 = vmov 683565275   ;;  %vm2853_vm9 = vmmov 0  }
  0x1c   : > { %2725 = vset.pattern.permute.xlu0 %v2841_v0  ;;  %2544 = vmatprep.subr.bf16.mxu0 %v2846_v4  ;;  %v2848_v21 = vmov 2475754826   ;;  %v2849_v24 = vmov 2131351028   ;;  %v2850_v27 = vmov 2102212464  }
  0x1d   : > { %s2439_s22 = sshll.u32 %s541_s21, 3  ;;  %s2845_s21 = smov 125   ;;  %2552 = vmatprep.subr.bf16.mxu1 %v2846_v4  ;;  %v2851_v30 = vmov 920167782   ;;  %v2852_v33 = vmov 1326507024   ;;  %2548 = vmatprep.mubr.msk.bf16.mxu0 %vm2853_vm9, %v2846_v4 }
  0x1e   : > { %s3007_s18 = scalar_lea.vmem %s3806_s30, %s2439_s22  ;;  %v774_v2 = vld [vmem:[%s3807_s2 + $0x10] sm:$0xff]  ;;  %v775_v3 = vld [vmem:[%s3807_s2 + $0x18] sm:$0xff]  ;;  %2560 = vmatprep.mubr.msk.bf16.mxu1 %vm2853_vm9, %v2846_v4  ;;  %s3794_s22 = smov 1  }
  0x1f   : > { %v3010_v1 = vld [vmem:[%s3007_s18] sm:$0xff]  ;;  %v778_v5 = vpack.c.bf16 %v775_v3, %v774_v2 }
  0x20   : > { %549 = vperm.xlu0 %2725, %v3010_v1   ;;  %1081 = vrot.lane.b32.xlu1 %v3010_v1, %s2842_s19  ;;  %s3792_s19 = smov 127  }
  0x21   : > { %2545 = vmatpush3.bf16.msra.mxu0 %v778_v5 }
  0x22   : > { %2546 = vmatprep.subr.bf16.mxu0 %v2846_v4 }
  0x24   : > { %1068 = vrot.lane.b32.xlu1 %v3010_v1, %s3790_s26 }
  0x28   : > { %1064 = vrot.lane.b32.xlu1 %v3010_v1, %s2844_s0  ;;  %s2854_s0 = smov 16  }
  0x2c   : > { %1029 = vrot.lane.b32.xlu1 %v3010_v1, %s2845_s21  ;;  %s3808_s21 = sld [smem:[#allocation9_spill]] }
  0x32   : > { %v2440_v6 = vld [vmem:[%s3808_s21] ss:$0 sm:$0xff]  ;;  %s2856_s21 = smov 2  }
  0x9b   : > { %v550_v7 = vpop.permute.xlu0 %549 }
  0x9c   : > { %v3030_v8 = vmul.f32 %v2440_v6, %v550_v7 }
  0x9e   : > { %v562_v9 = vand.u32 2139095040, %v3030_v8  ;;  %v559_v13 = vand.u32 2147483647, %v3030_v8  ;;  %vm561_vm7 = vcmp.lt.s32.totalorder %v3030_v8, 0 }
  0xa0   : > { %v563_v10 = vshrl.u32 %v562_v9, 23  ;;  %v566_v16 = vand.u32 8388607, %v559_v13  ;;  %vm560_vm8 = vcmp.le.f32.partialorder %v559_v13, 0.7853982 }
  0xa2   : > { %v2441_v11 = vadd.s32 4294967169, %v563_v10  ;;  %v567_v35 = vor.u32 8388608, %v566_v16 }
  0xa4   : > { %v569_v12 = vadd.s32 1, %v2441_v11  ;;  %v607_v49 = vshll.u32 %v567_v35, 8 }
  0xa6   : > { %vm570_vm0 = vcmp.gt.s32.totalorder %v569_v12, 0 }
  0xa7   : > { %v571_v14 = vsel %vm570_vm0, %v569_v12, 0  ;;  %vm651_vm0 = vweird.f32 %v3030_v8 }
  0xa8   : > { %v573_v15 = vand.u32 31, %v571_v14  ;;  %v572_v18 = vshrl.u32 %v571_v14, 5 }
  0xaa   : > { %v574_v17 = vsub.s32 32, %v573_v15  ;;  %v576_v20 = vshll.u32 %v2847_v19, %v573_v15  ;;  %v579_v22 = vshll.u32 %v2848_v21, %v573_v15  ;;  %v582_v26 = vshll.u32 %v2849_v24, %v573_v15 }
  0xab   : > { %v585_v29 = vshll.u32 %v2850_v27, %v573_v15  ;;  %v588_v32 = vshll.u32 %v2851_v30, %v573_v15  ;;  %vm591_vm1 = vcmp.lt.s32.totalorder %v572_v18, 1  ;;  %vm594_vm2 = vcmp.lt.s32.totalorder %v572_v18, 4 }
  0xac   : > { %v577_v23 = vshrl.u32 %v2848_v21, %v574_v17  ;;  %v580_v25 = vshrl.u32 %v2849_v24, %v574_v17  ;;  %v583_v28 = vshrl.u32 %v2850_v27, %v574_v17  ;;  %v586_v31 = vshrl.u32 %v2851_v30, %v574_v17 }
  0xad   : > { %v589_v34 = vshrl.u32 %v2852_v33, %v574_v17  ;;  %v575_v44 = vshrl.u32 %v2847_v19, %v574_v17  ;;  %vm593_vm3 = vcmp.lt.s32.totalorder %v572_v18, 3  ;;  %vm592_vm4 = vcmp.lt.s32.totalorder %v572_v18, 2 }
  0xae   : > { %v578_v36 = vor.u32 %v577_v23, %v576_v20  ;;  %v581_v37 = vor.u32 %v580_v25, %v579_v22  ;;  %v584_v38 = vor.u32 %v583_v28, %v582_v26  ;;  %v587_v39 = vor.u32 %v586_v31, %v585_v29 }
  0xaf   : > { %v590_v40 = vor.u32 %v589_v34, %v588_v32 }
  0xb0   : > { %v596_v41 = vsel %vm594_vm2, %v584_v38, 2102212464  ;;  %v599_v42 = vsel %vm591_vm1, %v578_v36, %v581_v37  ;;  %v603_v43 = vsel %vm591_vm1, %v581_v37, %v584_v38  ;;  %v600_v45 = vsel %vm594_vm2, %v587_v39, 920167782 }
  0xb1   : > { %v604_v46 = vsel %vm594_vm2, %v590_v40, 1326507024  ;;  %v601_v47 = vsel %vm593_vm3, %v584_v38, %v600_v45  ;;  %v595_v50 = vsel %vm591_vm1, %v575_v44, %v578_v36  ;;  %v597_v51 = vsel %vm593_vm3, %v581_v37, %v596_v41  ;;  %v772_v36 = vld [vmem:[%s3807_s2] sm:$0xff]  ;;  %v773_v37 = vld [vmem:[%s3807_s2 + $0x8] sm:$0xff]  ;;  %s2862_s2 = smov 64  }
  0xb2   : > { %v605_v48 = vsel %vm593_vm3, %v587_v39, %v604_v46  ;;  %v602_v52 = vsel %vm592_vm4, %v599_v42, %v601_v47  ;;  %v598_v58 = vsel %vm592_vm4, %v595_v50, %v597_v51  ;;  %v777_v38 = vpack.c.bf16 %v773_v37, %v772_v36  ;;  %v3067_v39 = vpop.permute.xlu1 %1081  ;;  %v837_v37 = vld [vmem:[%s3809_s4] sm:$0xff] }
  0xb3   : > { %v606_v53 = vsel %vm592_vm4, %v603_v43, %v605_v48  ;;  %v3050_v56 = vmul.u32.u64.low %v607_v49, %v602_v52  ;;  %v3051_v57 = vmul.u32.u64.high %v607_v49, %v602_v52, %v3050_v56  ;;  %v614_v60 = vmul.u32 %v607_v49, %v598_v58 }
  0xb4   : > { %v3047_v54 = vmul.u32.u64.low %v607_v49, %v606_v53  ;;  %v3048_v55 = vmul.u32.u64.high %v607_v49, %v606_v53, %v3047_v54  ;;  %2547 = vmatpush3.bf16.msra.mxu0 %v777_v38  ;;  %vm770_vm1 = vcmask 130048   ;;  %vm786_vm2 = vcmask 261120   ;;  %v838_v38 = vld [vmem:[%s3809_s4 + $0x8] sm:$0xff] }
  0xb5   : > { %v617_v59 = vadd.s32 1, %v3051_v57  ;;  %2564 = vmatprep.subr.bf16.mxu0 %v2846_v4 }
  0xb6   : > { %vm616_vm5 = vc.u32 %v3048_v55, %v3050_v56  ;;  %v615_v11 = vadd.s32 %v3050_v56, %v3048_v55  ;;  %v3074_v43 = vpop.permute.xlu1 %1068  ;;  %v1084_v56 = vmul.f32 %v3067_v39, %v3010_v1 }
  0xb7   : > { %v618_v61 = vsel %vm616_vm5, %v617_v59, %v3051_v57  ;;  %v1071_v58 = vmul.f32 %v3074_v43, %v3010_v1 }
  0xb8   : > { %v619_v62 = vadd.s32 %v618_v61, %v614_v60 }
  0xba   : > { %v620_v63 = vadd.s32 536870912, %v619_v62  ;;  %v1065_v55 = vpop.permute.xlu1 %1064 }
  0xbc   : > { %v621_v0 = vshrl.u32 %v620_v63, 30 }
  0xbe   : > { %v622_v2 = vshll.u32 %v621_v0, 30  ;;  %v645_v29 = vsub.s32 4, %v621_v0  ;;  %v3081_v57 = vpop.permute.xlu1 %1029 }
  0xc0   : > { %v623_v3 = vsub.s32 %v619_v62, %v622_v2  ;;  %v646_v34 = vsel %vm561_vm7, %v645_v29, %v621_v0  ;;  %v841_v29 = vld [vmem:[%s3809_s4 + $0x20] sm:$0xff] }
  0xc1   : > { %v648_v35 = vsel %vm560_vm8, 0, %v646_v34  ;;  %v839_v34 = vld [vmem:[%s3809_s4 + $0x10] sm:$0xff] }
  0xc2   : > { %v625_v5 = vsub.s32 0, %v623_v3  ;;  %v755_v40 = vadd.s32 3, %v648_v35  ;;  %v652_v13 = vand.u32 3, %v648_v35  ;;  %v840_v35 = vld [vmem:[%s3809_s4 + $0x18] sm:$0xff] }
  0xc3   : > { %v847_v36 = vpack.c.bf16 %v840_v35, %v839_v34  ;;  %v915_v34 = vld [vmem:[%s3775_s6 + $0x38] sm:$0xff] }
  0xc4   : > { %v2442_v6 = vmin.u32 %v625_v5, %v623_v3  ;;  %v756_v41 = vand.u32 3, %v755_v40  ;;  %vm657_vm10 = vcmp.eq.s32.totalorder %v652_v13, 2  ;;  %vm654_vm12 = vcmp.eq.s32.totalorder %v652_v13, 0 }
  0xc5   : > { %vm653_vm14 = vcmp.lt.s32.totalorder %v652_v13, 2  ;;  %v1067_v5 = vmul.f32 %v1065_v55, %v3010_v1  ;;  %v846_v40 = vpack.c.bf16 %v838_v38, %v837_v37  ;;  %v913_v37 = vld [vmem:[%s3775_s6 + $0x28] sm:$0xff] }
  0xc6   : > { %v627_v7 = vclz %v2442_v6  ;;  %vm761_vm11 = vcmp.eq.s32.totalorder %v756_v41, 2  ;;  %vm758_vm13 = vcmp.eq.s32.totalorder %v756_v41, 0  ;;  %vm757_vm15 = vcmp.lt.s32.totalorder %v756_v41, 2 }
  0xc8   : > { %v2443_v9 = vadd.s32 4294967294, %v627_v7 }
  0xca   : > { %vm2444_vm6 = vcmp.lt.s32.totalorder %v2443_v9, 0 }
  0xcb   : > { %v630_v10 = vsel %vm2444_vm6, 0, %v2443_v9 }
  0xcc   : > { %v631_v12 = vsub.s32 32, %v630_v10  ;;  %v635_v14 = vsub.s32 4294967266, %v630_v10  ;;  %v632_v15 = vshll.u32 %v623_v3, %v630_v10 }
  0xce   : > { %v633_v16 = vshrl.u32 %v615_v11, %v631_v12  ;;  %v636_v17 = vadd.s32 127, %v635_v14 }
  0xd0   : > { %v634_v18 = vor.u32 %v633_v16, %v632_v15  ;;  %v637_v20 = vshll.u32 %v636_v17, 23 }
  0xd2   : > { %v638_v22 = vor.u32 4788187, %v637_v20  ;;  %v641_v25 = vcvt.s32.f32 %v634_v18 }
  0xd4   : > { %v639_v23 = vand.u32 2147483647, %v638_v22 }
  0xd6   : > { %v642_v26 = vmul.f32 %v641_v25, %v639_v23  ;;  %v843_v25 = vld [vmem:[%s3809_s4 + $0x30] sm:$0xff] }
  0xd8   : > { %v643_v28 = vxor.u32 2147483648, %v642_v26 }
  0xda   : > { %v644_v31 = vsel %vm561_vm7, %v643_v28, %v642_v26  ;;  %v844_v26 = vld [vmem:[%s3809_s4 + $0x38] sm:$0xff]  ;;  %vm857_vm7 = vcmask 523264  }
  0xdb   : > { %v647_v32 = vsel %vm560_vm8, %v3030_v8, %v644_v31  ;;  %v3086_v8 = vsub.f32 %v3010_v1, %v3081_v57  ;;  %v849_v28 = vpack.c.bf16 %v844_v26, %v843_v25  ;;  %v842_v31 = vld [vmem:[%s3809_s4 + $0x28] sm:$0xff] }
  0xdc   : > { %2730 = vcosq.f32 %v647_v32 }
  0xdd   : > { %2732 = vsinq.f32 %v647_v32  ;;  %v1033_v59 = vmul.f32 %v3086_v8, %v3086_v8  ;;  %2553 = vmatpush3.bf16.msra.mxu1 %v849_v28  ;;  %v848_v32 = vpack.c.bf16 %v842_v31, %v841_v29  ;;  %v2858_v28 = vmov 33  }
  0xde   : > { %2554 = vmatprep.subr.bf16.mxu1 %v2846_v4  ;;  %2726 = vset.pattern.permute.xlu0 %v2858_v28 }
  0xe1   : > { %2555 = vmatpush3.bf16.msra.mxu1 %v848_v32  ;;  %v914_v32 = vld [vmem:[%s3775_s6 + $0x30] sm:$0xff] }
  0xe2   : > { %2556 = vmatprep.subr.bf16.mxu1 %v2846_v4  ;;  %v920_v35 = vpack.c.bf16 %v915_v34, %v914_v32 }
  0xe5   : > { %2557 = vmatpush3.bf16.msra.mxu1 %v847_v36  ;;  %v912_v36 = vld [vmem:[%s3775_s6 + $0x20] sm:$0xff] }
  0xe6   : > { %2558 = vmatprep.subr.bf16.mxu1 %v2846_v4  ;;  %v919_v38 = vpack.c.bf16 %v913_v37, %v912_v36 }
  0xe9   : > { %v2731_v42 = vpop.eup %2730  ;;  %2559 = vmatpush3.bf16.msra.mxu1 %v846_v40  ;;  %v910_v40 = vld [vmem:[%s3775_s6 + $0x10] sm:$0xff] }
  0xea   : > { %v2733_v44 = vpop.eup %2732  ;;  %v658_v45 = vxor.u32 2147483648, %v2731_v42  ;;  %2576 = vmatprep.subr.bf16.mxu1 %v2846_v4 }
  0xeb   : > { %v655_v46 = vxor.u32 2147483648, %v2733_v44 }
  0xec   : > { %v763_v47 = vsel %vm761_vm11, %v658_v45, %v2733_v44  ;;  %v659_v48 = vsel %vm657_vm10, %v658_v45, %v2733_v44 }
  0xed   : > { %v760_v49 = vsel %vm758_vm13, %v2731_v42, %v655_v46  ;;  %v656_v50 = vsel %vm654_vm12, %v2731_v42, %v655_v46 }
  0xee   : > { %v764_v51 = vsel %vm757_vm15, %v760_v49, %v763_v47  ;;  %v660_v52 = vsel %vm653_vm14, %v656_v50, %v659_v48 }
  0xef   : > { %v765_v53 = vsel %vm651_vm0, nan, %v764_v51  ;;  %v661_v54 = vsel %vm651_vm0, nan, %v660_v52 }
  0xf0   : > { %767 = vrot.lane.b32.xlu0 %v765_v53, %s2854_s0  ;;  %v2449_v53 = vld [vmem:[%s3812_s3] ss:$0 sm:$0xff]  ;;  %s2499_s3 = sshll.u32 %s2975_s28, 7  ;;  %s2863_s28 = smov [#allocation2]  }
  0xf4   : > { %1077 = vrot.lane.b32.xlu0 %v3010_v1, %s3792_s19 }
  0xf8   : > { %1086 = vrot.lane.b32.xlu0 %v1084_v56, %s2856_s21 }
  0xfc   : > { %1073 = vrot.lane.b32.xlu0 %v1071_v58, %s3792_s19 }
 0x100   : > { %1035 = vrot.lane.b32.xlu0 %v1033_v59, %s3792_s19 }
 0x104   : > { %1039 = vrot.lane.b32.xlu0 %v1033_v59, %s3790_s26  ;;  %s3813_s26 = smov 126  }
 0x162   : > { %v768_v60 = vpop.permute.xlu0 %767 }
 0x163   : > { %v771_v61 = vsel %vm770_vm1, %v661_v54, %v768_v60 }
 0x164   : > { %v776_v62 = vpack.c.bf16 %v771_v61, %v771_v61 }
 0x166   : > { %v1078_v63 = vpop.permute.xlu0 %1077  ;;  %2549 = vmatmul.mubr.msk.bf16.vlgmr.msra.gmra.mxu0 %vm786_vm2, %v776_v62 }
 0x167   : > { %2572 = vmatprep.mubr.msk.bf16.mxu0 %vm2853_vm9, %v2846_v4  ;;  %v1080_v0 = vmul.f32 %v1078_v63, %v3010_v1  ;;  %2565 = vmatpush3.bf16.msra.mxu0 %v920_v35 }
 0x168   : > { %2566 = vmatprep.subr.bf16.mxu0 %v2846_v4 }
 0x16a   : > { %v1087_v2 = vpop.permute.xlu0 %1086 }
 0x16b   : > { %v3099_v3 = vsub.f32 %v1080_v0, %v1087_v2  ;;  %2567 = vmatpush3.bf16.msra.mxu0 %v919_v38 }
 0x16c   : > { %2568 = vmatprep.subr.bf16.mxu0 %v2846_v4 }
 0x16d   : > { %v1091_v6 = vmul.f32 %v3099_v3, %v3099_v3 }
 0x16e   : > { %v1074_v7 = vpop.permute.xlu0 %1073 }
 0x16f   : > { %v3104_v9 = vsub.f32 %v1067_v5, %v1074_v7  ;;  %1093 = vrot.lane.b32.xlu1 %v1091_v6, %s3792_s19  ;;  %s2861_s19 = smov 96  }
 0x171   : > { %v1090_v10 = vmul.f32 %v3104_v9, %v3104_v9 }
 0x172   : > { %v1036_v11 = vpop.permute.xlu0 %1035 }
 0x173   : > { %1098 = vrot.lane.b32.xlu1 %v1090_v10, %s3794_s22  ;;  %v1038_v12 = vadd.f32 %v1036_v11, %v1033_v59 }
 0x176   : > { %v1040_v14 = vpop.permute.xlu0 %1039 }
 0x177   : > { %v1042_v15 = vadd.f32 %v1040_v14, %v1038_v12 }
 0x179   : > { %2734 = vrsqrt.f32 %v1042_v15  ;;  %vm1045_vm3 = vcmp.eq.f32.partialorder %v1042_v15, inf  ;;  %v1048_v18 = vand.u32 2147483648, %v1042_v15  ;;  %vm1047_vm4 = vcmp.eq.f32.partialorder %v1042_v15, 0.0 }
 0x186   : > { %v2735_v16 = vpop.eup %2734 }
 0x187   : > { %v1044_v17 = vmul.f32 %v2735_v16, %v1042_v15 }
 0x189   : > { %v1046_v20 = vsel %vm1045_vm3, %v1042_v15, %v1044_v17 }
 0x18a   : > { %v1049_v22 = vsel %vm1047_vm4, %v1048_v18, %v1046_v20 }
 0x18b   : > { %v1050_v23 = vadd.f32 1e-08, %v1049_v22 }
 0x18d   : > { %1054 = vrot.lane.b32.xlu0 %v1050_v23, %s3794_s22 }
 0x191   : > { %1059 = vrot.lane.b32.xlu0 %v1050_v23, %s2856_s21 }
 0x1e1   : > { %v1094_v13 = vpop.permute.xlu1 %1093 }
 0x1e2   : > { %v1096_v41 = vadd.f32 %v1094_v13, %v1090_v10  ;;  %v911_v13 = vld [vmem:[%s3775_s6 + $0x18] sm:$0xff] }
 0x1e5   : > { %v1099_v42 = vpop.permute.xlu1 %1098 }
 0x1e6   : > { %v1101_v44 = vadd.f32 %v1099_v42, %v1096_v41  ;;  %v918_v41 = vpack.c.bf16 %v911_v13, %v910_v40  ;;  %v908_v42 = vld [vmem:[%s3775_s6] sm:$0xff] }
 0x1e8   : > { %2736 = vrsqrt.f32 %v1101_v44  ;;  %vm1104_vm5 = vcmp.eq.f32.partialorder %v1101_v44, inf  ;;  %v1107_v47 = vand.u32 2147483648, %v1101_v44  ;;  %vm1106_vm6 = vcmp.eq.f32.partialorder %v1101_v44, 0.0  ;;  %2569 = vmatpush3.bf16.msra.mxu0 %v918_v41 }
 0x1e9   : > { %2570 = vmatprep.subr.bf16.mxu0 %v2846_v4 }
 0x1f5   : > { %v2737_v45 = vpop.eup %2736 }
 0x1f6   : > { %v1103_v46 = vmul.f32 %v2737_v45, %v1101_v44 }
 0x1f8   : > { %v1105_v48 = vsel %vm1104_vm5, %v1101_v44, %v1103_v46  ;;  %v909_v44 = vld [vmem:[%s3775_s6 + $0x8] sm:$0xff] }
 0x1f9   : > { %v1108_v49 = vsel %vm1106_vm6, %v1107_v47, %v1105_v48  ;;  %v917_v45 = vpack.c.bf16 %v909_v44, %v908_v42  ;;  %v2859_v47 = vmov 34   ;;  %v973_v42 = vld [vmem:[%s3777_s8 + $0x8] sm:$0xff] }
 0x1fa   : > { %v1109_v50 = vadd.f32 1e-08, %v1108_v49  ;;  %2727 = vset.pattern.permute.xlu1 %v2859_v47 }
 0x1fb   : > { %2571 = vmatpush3.bf16.msra.mxu0 %v917_v45  ;;  %v3242_v45 = vld [vmem:[%s3779_s10] ss:$0 sm:$0xff] }
 0x1fc   : > { %1118 = vrot.lane.b32.xlu1 %v1109_v50, %s3810_s23  ;;  %2738 = vrcp.f32 %v1109_v50  ;;  %2584 = vmatprep.subr.bf16.mxu0 %v2846_v4 }
 0x1ff   : > { %v1055_v5 = vpop.permute.xlu0 %1054 }
 0x200   : > { %1113 = vrot.lane.b32.xlu1 %v1109_v50, %s3811_s29 }
 0x203   : > { %v1060_v7 = vpop.permute.xlu0 %1059 }
 0x209   : > { %v2739_v51 = vpop.eup %2738 }
 0x20a   : > { %v1111_v52 = vmul.f32 %v2739_v51, %v3104_v9 }
 0x20c   : > { %1135 = vrot.lane.b32.xlu1 %v1111_v52, %s3811_s29 }
 0x226   : > { %v824_v54 = vpop.f32.mrf.mxu0 }
 0x227   : > { %v825_v55 = vadd.f32 %v2449_v53, %v824_v54 }
 0x228   : > { %v2550_v56 = vpop.f32.mrf.mxu0 }
 0x229   : > { %v2451_v58 = vmul.f32 -1.442695, %v825_v55 }
 0x22a   : > { %v827_v59 = vpop.f32.mrf.mxu0 }
 0x22b   : > { %2740 = vpow2.f32 %v2451_v58 }
 0x22c   : > { %v2551_v60 = vpop.f32.mrf.mxu0 }
 0x238   : > { %v2741_v61 = vpop.eup %2740 }
 0x239   : > { %v833_v62 = vadd.f32 1.0, %v2741_v61 }
 0x23b   : > { %2742 = vrcp.f32 %v833_v62 }
 0x23c   : > { %2744 = vrcp.f32 %v1050_v23 }
 0x23d   : > { %2746 = vrcp.f32 %v1055_v5 }
 0x248   : > { %v2743_v63 = vpop.eup %2742 }
 0x249   : > { %v836_v0 = vmul.f32 %v2743_v63, %v825_v55  ;;  %v2745_v11 = vpop.eup %2744 }
 0x24a   : > { %v2747_v12 = vpop.eup %2746  ;;  %v3151_v15 = vmul.f32 %v2745_v11, %v3086_v8 }
 0x24b   : > { %v845_v2 = vpack.c.bf16 %v836_v0, %v836_v0  ;;  %v1058_v18 = vmul.f32 %v2747_v12, %v3086_v8 }
 0x24c   : > { %v1156_v32 = vmul.f32 %v3151_v15, %v3010_v1 }
 0x24d   : > { %2561 = vmatmul.mubr.msk.bf16.vlgmr.msra.gmra.mxu1 %vm857_vm7, %v845_v2  ;;  %v1150_v25 = vmul.f32 %v1111_v52, %v1058_v18  ;;  %v1185_v2 = vmul.f32 %v3151_v15, %v3081_v57 }
 0x24e   : > { %2580 = vmatprep.mubr.msk.bf16.mxu1 %vm2853_vm9, %v2846_v4 }
 0x26e   : > { %v1119_v6 = vpop.permute.xlu1 %1118 }
 0x26f   : > { %2748 = vrcp.f32 %v1119_v6 }
 0x272   : > { %v1114_v10 = vpop.permute.xlu1 %1113 }
 0x273   : > { %2750 = vrcp.f32 %v1114_v10 }
 0x274   : > { %2752 = vrcp.f32 %v1060_v7 }
 0x27c   : > { %v2749_v14 = vpop.eup %2748 }
 0x27d   : > { %v1122_v16 = vmul.f32 %v2749_v14, %v3104_v9 }
 0x27e   : > { %v1136_v46 = vpop.permute.xlu1 %1135 }
 0x27f   : > { %v1139_v17 = vmul.f32 %v1122_v16, %v3151_v15 }
 0x280   : > { %v2751_v20 = vpop.eup %2750 }
 0x281   : > { %1141 = vrot.lane.b32.xlu0 %v1139_v17, %s2856_s21  ;;  %v1117_v22 = vmul.f32 %v2751_v20, %v3099_v3  ;;  %v2753_v23 = vpop.eup %2752  ;;  %v1186_v3 = vmul.f32 %v1058_v18, %v3081_v57 }
 0x282   : > { %v1063_v26 = vmul.f32 %v2753_v23, %v3086_v8  ;;  %v1157_v8 = vmul.f32 %v1058_v18, %v3010_v1 }
 0x283   : > { %1146 = vrot.lane.b32.xlu1 %v1117_v22, %s3813_s26 }
 0x284   : > { %v1128_v9 = vmul.f32 %v1117_v22, %v1063_v26  ;;  %v1192_v29 = vmul.f32 %v1063_v26, %v3081_v57  ;;  %v1163_v31 = vmul.f32 %v1063_v26, %v3010_v1  ;;  %v1138_v48 = vmul.f32 %v1136_v46, %v1063_v26 }
 0x285   : > { %1152 = vrot.lane.b32.xlu0 %v1150_v25, %s3810_s23 }
 0x287   : > { %1124 = vrot.lane.b32.xlu1 %v1122_v16, %s3811_s29 }
 0x289   : > { %1130 = vrot.lane.b32.xlu0 %v1128_v9, %s3810_s23 }
 0x28b   : > { %1169 = vrot.lane.b32.xlu1 %v3010_v1, %s3811_s29  ;;  %v975_v1 = vld [vmem:[%s3777_s8 + $0x18] sm:$0xff] }
 0x28d   : > { %1188 = vrot.lane.b32.xlu0 %v1186_v3, %s3810_s23 }
 0x291   : > { %1194 = vrot.lane.b32.xlu0 %v1192_v29, %s3813_s26 }
 0x295   : > { %1159 = vrot.lane.b32.xlu0 %v1157_v8, %s3810_s23 }
 0x299   : > { %1165 = vrot.lane.b32.xlu0 %v1163_v31, %s3813_s26  ;;  %s2860_s26 = smov 32  }
 0x2f3   : > { %v1142_v49 = vpop.permute.xlu0 %1141 }
 0x2f4   : > { %v1144_v50 = vsub.f32 %v1138_v48, %v1142_v49 }
 0x2f5   : > { %v1147_v51 = vpop.permute.xlu1 %1146 }
 0x2f6   : > { %v1199_v52 = vmul.f32 %v1144_v50, %v3074_v43  ;;  %v1149_v53 = vmul.f32 %v1147_v51, %v3151_v15 }
 0x2f7   : > { %v1153_v54 = vpop.permute.xlu0 %1152 }
 0x2f8   : > { %v1155_v55 = vsub.f32 %v1149_v53, %v1153_v54  ;;  %1201 = vrot.lane.b32.xlu1 %v1199_v52, %s3810_s23 }
 0x2f9   : > { %v1125_v56 = vpop.permute.xlu1 %1124 }
 0x2fa   : > { %v1205_v58 = vmul.f32 %v1155_v55, %v3067_v39  ;;  %v1127_v59 = vmul.f32 %v1125_v56, %v1058_v18  ;;  %v1179_v5 = vmul.f32 %v1155_v55, %v3074_v43  ;;  %v2452_v39 = vld [vmem:[%s3774_s5] ss:$0 sm:$0xff] }
 0x2fb   : > { %v1131_v60 = vpop.permute.xlu0 %1130 }
 0x2fc   : > { %v1133_v61 = vsub.f32 %v1127_v59, %v1131_v60  ;;  %1207 = vrot.lane.b32.xlu1 %v1205_v58, %s3811_s29 }
 0x2fd   : > { %v1170_v62 = vpop.permute.xlu1 %1169 }
 0x2fe   : > { %v1173_v63 = vmul.f32 %v1170_v62, %v1144_v50  ;;  %v1198_v3 = vmul.f32 %v1133_v61, %v3074_v43  ;;  %v1172_v37 = vmul.f32 %v1170_v62, %v1133_v61  ;;  %v974_v43 = vld [vmem:[%s3777_s8 + $0x10] sm:$0xff] }
 0x2ff   : > { %v1189_v0 = vpop.permute.xlu0 %1188  ;;  %v978_v15 = vpack.c.bf16 %v975_v1, %v974_v43 }
 0x300   : > { %1175 = vrot.lane.b32.xlu1 %v1173_v63, %s3810_s23  ;;  %v1191_v6 = vadd.f32 %v1189_v0, %v1185_v2 }
 0x301   : > { %2577 = vmatpush3.bf16.msra.mxu1 %v978_v15 }
 0x302   : > { %2578 = vmatprep.subr.bf16.mxu1 %v2846_v4 }
 0x303   : > { %v1195_v7 = vpop.permute.xlu0 %1194 }
 0x304   : > { %v1197_v10 = vadd.f32 %v1195_v7, %v1191_v6  ;;  %1181 = vrot.lane.b32.xlu1 %v1179_v5, %s3811_s29  ;;  %s3733_s29 = scalar_lea.hbm %s3786_s17, %s2499_s3 }
 0x306   : > { %1736 = vperm.xlu0 %2726, %v1197_v10  }
 0x307   : > { %v1160_v9 = vpop.permute.xlu0 %1159 }
 0x308   : > { %v1162_v35 = vadd.f32 %v1160_v9, %v1156_v32 }
 0x30a   : > { %2729 = vset.pattern.permute.xlu0 %v2859_v47 }
 0x30b   : > { %v1166_v34 = vpop.permute.xlu0 %1165 }
 0x30c   : > { %v1168_v38 = vadd.f32 %v1166_v34, %v1162_v35 }
 0x30d   : > { %v895_v11 = vpop.f32.mrf.mxu1 }
 0x30e   : > { %v3215_v12 = vadd.f32 %v2452_v39, %v895_v11 }
 0x30f   : > { %v2562_v14 = vpop.f32.mrf.mxu1 }
 0x310   : > { %v2454_v57 = vmul.f32 -1.442695, %v3215_v12 }
 0x311   : > { %v898_v16 = vpop.f32.mrf.mxu1 }
 0x312   : > { %2754 = vpow2.f32 %v2454_v57 }
 0x313   : > { %v2563_v17 = vpop.f32.mrf.mxu1 }
 0x31f   : > { %v2755_v18 = vpop.eup %2754 }
 0x320   : > { %v904_v20 = vadd.f32 1.0, %v2755_v18 }
 0x322   : > { %2756 = vrcp.f32 %v904_v20 }
 0x32f   : > { %v2757_v22 = vpop.eup %2756 }
 0x330   : > { %v907_v23 = vmul.f32 %v2757_v22, %v3215_v12 }
 0x332   : > { %v916_v25 = vpack.c.bf16 %v907_v23, %v907_v23 }
 0x334   : > { %2573 = vmatmul.mubr.msk.bf16.vlgmr.msra.gmra.mxu0 %vm857_vm7, %v916_v25 }
 0x335   : > { %2600 = vmatprep.mubr.msk.bf16.mxu0 %vm2853_vm9, %v2846_v4 }
 0x36a   : > { %v1202_v26 = vpop.permute.xlu1 %1201 }
 0x36b   : > { %v1204_v29 = vadd.f32 %v1202_v26, %v1198_v3 }
 0x36e   : > { %v1208_v8 = vpop.permute.xlu1 %1207 }
 0x36f   : > { %v1210_v31 = vadd.f32 %v1208_v8, %v1204_v29 }
 0x371   : > { %1743 = vperm.xlu1 %2727, %v1210_v31  }
 0x372   : > { %v1176_v36 = vpop.permute.xlu1 %1175 }
 0x373   : > { %v1178_v40 = vadd.f32 %v1176_v36, %v1172_v37 }
 0x375   : > { %2728 = vset.pattern.permute.xlu1 %v2858_v28  ;;  %v972_v28 = vld [vmem:[%s3777_s8] sm:$0xff] }
 0x376   : > { %v1182_v13 = vpop.permute.xlu1 %1181  ;;  %1214 = vperm.xlu1 %2728, %v1168_v38   ;;  %v977_v44 = vpack.c.bf16 %v973_v42, %v972_v28 }
 0x377   : > { %v1184_v41 = vadd.f32 %v1182_v13, %v1178_v40 }
 0x378   : > { %2579 = vmatpush3.bf16.msra.mxu1 %v977_v44 }
 0x379   : > { %1227 = vperm.xlu0 %2729, %v1184_v41   ;;  %2604 = vmatprep.subr.bf16.mxu1 %v2846_v4 }
 0x381   : > { %v1737_v46 = vpop.permute.xlu0 %1736 }
 0x382   : > { %v1739_v47 = vmul.f32 %v3242_v45, %v1737_v46 }
 0x384   : > { %v3246_v48 = vmul.f32 6.2831855, %v1739_v47 }
 0x386   : > { %v1751_v49 = vand.u32 2139095040, %v3246_v48  ;;  %v1748_v50 = vand.u32 2147483647, %v3246_v48  ;;  %vm1750_vm0 = vcmp.lt.s32.totalorder %v3246_v48, 0 }
 0x388   : > { %v1752_v51 = vshrl.u32 %v1751_v49, 23  ;;  %v1755_v53 = vand.u32 8388607, %v1748_v50  ;;  %vm1749_vm1 = vcmp.le.f32.partialorder %v1748_v50, 0.7853982 }
 0x38a   : > { %v2477_v52 = vadd.s32 4294967169, %v1752_v51  ;;  %v1756_v56 = vor.u32 8388608, %v1755_v53 }
 0x38c   : > { %v1758_v54 = vadd.s32 1, %v2477_v52  ;;  %v1796_v63 = vshll.u32 %v1756_v56, 8 }
 0x38e   : > { %vm1759_vm8 = vcmp.gt.s32.totalorder %v1758_v54, 0 }
 0x38f   : > { %v1760_v55 = vsel %vm1759_vm8, %v1758_v54, 0 }
 0x390   : > { %v1762_v58 = vand.u32 31, %v1760_v55  ;;  %v1761_v59 = vshrl.u32 %v1760_v55, 5 }
 0x392   : > { %v1763_v60 = vsub.s32 32, %v1762_v58  ;;  %v1774_v61 = vshll.u32 %v2850_v27, %v1762_v58  ;;  %v1777_v62 = vshll.u32 %v2851_v30, %v1762_v58  ;;  %v1765_v5 = vshll.u32 %v2847_v19, %v1762_v58 }
 0x393   : > { %v1768_v7 = vshll.u32 %v2848_v21, %v1762_v58  ;;  %v1771_v39 = vshll.u32 %v2849_v24, %v1762_v58  ;;  %vm1783_vm10 = vcmp.lt.s32.totalorder %v1761_v59, 4  ;;  %vm1780_vm11 = vcmp.lt.s32.totalorder %v1761_v59, 1 }
 0x394   : > { %v1775_v0 = vshrl.u32 %v2851_v30, %v1763_v60  ;;  %v1778_v2 = vshrl.u32 %v2852_v33, %v1763_v60  ;;  %v1766_v6 = vshrl.u32 %v2848_v21, %v1763_v60  ;;  %v1769_v10 = vshrl.u32 %v2849_v24, %v1763_v60 }
 0x395   : > { %v1772_v11 = vshrl.u32 %v2850_v27, %v1763_v60  ;;  %v1764_v17 = vshrl.u32 %v2847_v19, %v1763_v60  ;;  %vm1781_vm12 = vcmp.lt.s32.totalorder %v1761_v59, 2  ;;  %vm1782_vm13 = vcmp.lt.s32.totalorder %v1761_v59, 3 }
 0x396   : > { %v1776_v14 = vor.u32 %v1775_v0, %v1774_v61  ;;  %v1779_v57 = vor.u32 %v1778_v2, %v1777_v62  ;;  %v1767_v16 = vor.u32 %v1766_v6, %v1765_v5  ;;  %v1770_v18 = vor.u32 %v1769_v10, %v1768_v7 }
 0x397   : > { %v1773_v20 = vor.u32 %v1772_v11, %v1771_v39 }
 0x398   : > { %v1789_v22 = vsel %vm1783_vm10, %v1776_v14, 920167782  ;;  %v1793_v23 = vsel %vm1783_vm10, %v1779_v57, 1326507024  ;;  %v1788_v26 = vsel %vm1780_vm11, %v1767_v16, %v1770_v18  ;;  %v1784_v29 = vsel %vm1780_vm11, %v1764_v17, %v1767_v16 }
 0x399   : > { %v1785_v25 = vsel %vm1783_vm10, %v1773_v20, 2102212464  ;;  %v1790_v9 = vsel %vm1782_vm13, %v1773_v20, %v1789_v22  ;;  %v1792_v3 = vsel %vm1780_vm11, %v1770_v18, %v1773_v20  ;;  %v1794_v32 = vsel %vm1782_vm13, %v1776_v14, %v1793_v23 }
 0x39a   : > { %v1786_v8 = vsel %vm1782_vm13, %v1770_v18, %v1785_v25  ;;  %v1791_v31 = vsel %vm1781_vm12, %v1788_v26, %v1790_v9  ;;  %v1795_v34 = vsel %vm1781_vm12, %v1792_v3, %v1794_v32  ;;  %vm1840_vm11 = vweird.f32 %v3246_v48  ;;  %v1677_v32 = vld [vmem:[%s3780_s11 + $0x78] sm:$0xff] }
 0x39b   : > { %v3263_v35 = vmul.u32.u64.low %v1796_v63, %v1791_v31  ;;  %v3264_v36 = vmul.u32.u64.high %v1796_v63, %v1791_v31, %v3263_v35  ;;  %v3266_v37 = vmul.u32.u64.low %v1796_v63, %v1795_v34  ;;  %v3267_v38 = vmul.u32.u64.high %v1796_v63, %v1795_v34, %v3266_v37  ;;  %v1676_v31 = vld [vmem:[%s3780_s11 + $0x70] sm:$0xff] }
 0x39c   : > { %v1787_v40 = vsel %vm1781_vm12, %v1784_v29, %v1786_v8  ;;  %v3287_v34 = vpack.c.bf16 %v1677_v32, %v1676_v31  ;;  %v1672_v37 = vld [vmem:[%s3780_s11 + $0x50] sm:$0xff] }
 0x39d   : > { %v1806_v13 = vadd.s32 1, %v3264_v36  ;;  %v1803_v41 = vmul.u32 %v1796_v63, %v1787_v40  ;;  %vm1805_vm14 = vc.u32 %v3267_v38, %v3263_v35  ;;  %v1804_v53 = vadd.s32 %v3263_v35, %v3267_v38  ;;  %v1675_v35 = vld [vmem:[%s3780_s11 + $0x68] sm:$0xff]  ;;  %v1673_v38 = vld [vmem:[%s3780_s11 + $0x58] sm:$0xff] }
 0x39e   : > { %2585 = vmatpush3.bf16.msra.mxu0 %v3287_v34 }
 0x39f   : > { %v1807_v43 = vsel %vm1805_vm14, %v1806_v13, %v3264_v36  ;;  %2586 = vmatprep.subr.bf16.mxu0 %v2846_v4 }
 0x3a0   : > { %v1808_v1 = vadd.s32 %v1807_v43, %v1803_v41  ;;  %v3308_v41 = vpack.c.bf16 %v1673_v38, %v1672_v37 }
 0x3a2   : > { %v1809_v15 = vadd.s32 536870912, %v1808_v1 }
 0x3a4   : > { %v1810_v28 = vshrl.u32 %v1809_v15, 30  ;;  %v1671_v15 = vld [vmem:[%s3780_s11 + $0x48] sm:$0xff] }
 0x3a6   : > { %v1811_v42 = vshll.u32 %v1810_v28, 30  ;;  %v1834_v6 = vsub.s32 4, %v1810_v28 }
 0x3a8   : > { %v1812_v44 = vsub.s32 %v1808_v1, %v1811_v42  ;;  %v1835_v39 = vsel %vm1750_vm0, %v1834_v6, %v1810_v28  ;;  %v1670_v1 = vld [vmem:[%s3780_s11 + $0x40] sm:$0xff] }
 0x3a9   : > { %v1837_v11 = vsel %vm1749_vm1, 0, %v1835_v39  ;;  %v2778_v6 = vld [vmem:[%s3007_s18] sm:$0xff]  ;;  %s537_s18 = sand.u32 1, %s2831_s25  }
 0x3aa   : > { %v1814_v46 = vsub.s32 0, %v1812_v44  ;;  %v1841_v14 = vadd.s32 3, %v1837_v11  ;;  %v1945_v16 = vand.u32 3, %v1837_v11  ;;  %s2438_s30 = sshll.u32 %s537_s18, 3 }
 0x3ac   : > { %v2478_v47 = vmin.u32 %v1814_v46, %v1812_v44  ;;  %v1842_v57 = vand.u32 3, %v1841_v14  ;;  %vm1950_vm4 = vcmp.eq.s32.totalorder %v1945_v16, 2  ;;  %vm1947_vm6 = vcmp.eq.s32.totalorder %v1945_v16, 0 }
 0x3ad   : > { %vm1946_vm10 = vcmp.lt.s32.totalorder %v1945_v16, 2 }
 0x3ae   : > { %v1816_v49 = vclz %v2478_v47  ;;  %vm1847_vm3 = vcmp.eq.s32.totalorder %v1842_v57, 2  ;;  %vm1844_vm5 = vcmp.eq.s32.totalorder %v1842_v57, 0  ;;  %vm1843_vm8 = vcmp.lt.s32.totalorder %v1842_v57, 2  ;;  %v2455_v47 = vld [vmem:[%s3776_s7] ss:$0 sm:$0xff] }
 0x3b0   : > { %v2479_v51 = vadd.s32 4294967294, %v1816_v49  ;;  %v3326_v49 = vpack.c.bf16 %v1671_v15, %v1670_v1 }
 0x3b2   : > { %vm2480_vm15 = vcmp.lt.s32.totalorder %v2479_v51, 0 }
 0x3b3   : > { %v1819_v52 = vsel %vm2480_vm15, 0, %v2479_v51 }
 0x3b4   : > { %v1820_v54 = vsub.s32 32, %v1819_v52  ;;  %v1824_v55 = vsub.s32 4294967266, %v1819_v52  ;;  %v1821_v56 = vshll.u32 %v1812_v44, %v1819_v52  ;;  %v1668_v52 = vld [vmem:[%s3780_s11 + $0x30] sm:$0xff] }
 0x3b6   : > { %v1822_v58 = vshrl.u32 %v1804_v53, %v1820_v54  ;;  %v1825_v59 = vadd.s32 127, %v1824_v55  ;;  %v1669_v53 = vld [vmem:[%s3780_s11 + $0x38] sm:$0xff] }
 0x3b8   : > { %v1823_v60 = vor.u32 %v1822_v58, %v1821_v56  ;;  %v1826_v61 = vshll.u32 %v1825_v59, 23 }
 0x3ba   : > { %v1827_v62 = vor.u32 4788187, %v1826_v61  ;;  %v1830_v0 = vcvt.s32.f32 %v1823_v60 }
 0x3bc   : > { %v1828_v63 = vand.u32 2147483647, %v1827_v62 }
 0x3be   : > { %v1831_v2 = vmul.f32 %v1830_v0, %v1828_v63  ;;  %v3342_v0 = vpack.c.bf16 %v1669_v53, %v1668_v52 }
 0x3c0   : > { %v1832_v5 = vxor.u32 2147483648, %v1831_v2 }
 0x3c2   : > { %v1833_v7 = vsel %vm1750_vm0, %v1832_v5, %v1831_v2 }
 0x3c3   : > { %v1836_v10 = vsel %vm1749_vm1, %v3246_v48, %v1833_v7  ;;  %v1674_v48 = vld [vmem:[%s3780_s11 + $0x60] sm:$0xff] }
 0x3c4   : > { %2758 = vcosq.f32 %v1836_v10  ;;  %v3297_v36 = vpack.c.bf16 %v1675_v35, %v1674_v48 }
 0x3c5   : > { %2760 = vsinq.f32 %v1836_v10  ;;  %v1667_v10 = vld [vmem:[%s3780_s11 + $0x28] sm:$0xff] }
 0x3c6   : > { %2587 = vmatpush3.bf16.msra.mxu0 %v3297_v36 }
 0x3c7   : > { %2588 = vmatprep.subr.bf16.mxu0 %v2846_v4 }
 0x3ca   : > { %2589 = vmatpush3.bf16.msra.mxu0 %v3308_v41 }
 0x3cb   : > { %2590 = vmatprep.subr.bf16.mxu0 %v2846_v4 }
 0x3ce   : > { %2591 = vmatpush3.bf16.msra.mxu0 %v3326_v49 }
 0x3cf   : > { %2592 = vmatprep.subr.bf16.mxu0 %v2846_v4 }
 0x3d1   : > { %v2759_v17 = vpop.eup %2758 }
 0x3d2   : > { %v2761_v18 = vpop.eup %2760  ;;  %v1848_v20 = vxor.u32 2147483648, %v2759_v17  ;;  %2593 = vmatpush3.bf16.msra.mxu0 %v3342_v0 }
 0x3d3   : > { %v1845_v22 = vxor.u32 2147483648, %v2761_v18  ;;  %2594 = vmatprep.subr.bf16.mxu0 %v2846_v4 }
 0x3d4   : > { %v1952_v23 = vsel %vm1950_vm4, %v1848_v20, %v2761_v18  ;;  %v1849_v50 = vsel %vm1847_vm3, %v1848_v20, %v2761_v18 }
 0x3d5   : > { %v1949_v25 = vsel %vm1947_vm6, %v2759_v17, %v1845_v22  ;;  %v1846_v26 = vsel %vm1844_vm5, %v2759_v17, %v1845_v22 }
 0x3d6   : > { %v1953_v9 = vsel %vm1946_vm10, %v1949_v25, %v1952_v23  ;;  %v1850_v3 = vsel %vm1843_vm8, %v1846_v26, %v1849_v50  ;;  %v1664_v25 = vld [vmem:[%s3780_s11 + $0x10] sm:$0xff]  ;;  %v1665_v26 = vld [vmem:[%s3780_s11 + $0x18] sm:$0xff] }
 0x3d7   : > { %v1954_v29 = vsel %vm1840_vm11, nan, %v1953_v9  ;;  %v3278_v8 = vsel %vm1840_vm11, nan, %v1850_v3  ;;  %v3379_v38 = vpack.c.bf16 %v1665_v26, %v1664_v25 }
 0x3d8   : > { %2163 = vrot.lane.b32.xlu1 %v1954_v29, %s2860_s26 }
 0x3ec   : > { %v1744_v40 = vpop.permute.xlu1 %1743 }
 0x3ed   : > { %v1746_v13 = vmul.f32 %v3242_v45, %v1744_v40 }
 0x3ef   : > { %v3310_v43 = vmul.f32 6.2831855, %v1746_v13 }
 0x3f1   : > { %v1958_v28 = vand.u32 2139095040, %v3310_v43  ;;  %v1215_v42 = vpop.permute.xlu1 %1214  ;;  %v1955_v44 = vand.u32 2147483647, %v3310_v43 }
 0x3f2   : > { %v1223_v46 = vmul.f32 %v3242_v45, %v1215_v42 }
 0x3f3   : > { %v1959_v51 = vshrl.u32 %v1958_v28, 23  ;;  %v1962_v61 = vand.u32 8388607, %v1955_v44 }
 0x3f4   : > { %v3334_v54 = vmul.f32 6.2831855, %v1223_v46  ;;  %v1228_v55 = vpop.permute.xlu0 %1227  ;;  %v965_v56 = vpop.f32.mrf.mxu0 }
 0x3f5   : > { %v2485_v58 = vadd.s32 4294967169, %v1959_v51  ;;  %v1230_v59 = vmul.f32 %v3242_v45, %v1228_v55  ;;  %v966_v60 = vadd.f32 %v2455_v47, %v965_v56  ;;  %v1666_v45 = vld [vmem:[%s3780_s11 + $0x20] sm:$0xff]  ;;  %v1963_v17 = vor.u32 8388608, %v1962_v61 }
 0x3f6   : > { %v1235_v62 = vand.u32 2139095040, %v3334_v54  ;;  %v2574_v63 = vpop.f32.mrf.mxu0  ;;  %v1232_v14 = vand.u32 2147483647, %v3334_v54  ;;  %v3358_v50 = vpack.c.bf16 %v1667_v10, %v1666_v45 }
 0x3f7   : > { %v1965_v2 = vadd.s32 1, %v2485_v58  ;;  %v3344_v5 = vmul.f32 6.2831855, %v1230_v59  ;;  %v971_v7 = vadd.f32 %v2778_v6, %v966_v60  ;;  %v3376_v37 = vshll.u32 %v1963_v17, 8 }
 0x3f8   : > { %v1236_v39 = vshrl.u32 %v1235_v62, 23  ;;  %v968_v11 = vpop.f32.mrf.mxu0  ;;  %v3373_v48 = vand.u32 8388607, %v1232_v14  ;;  %2595 = vmatpush3.bf16.msra.mxu0 %v3358_v50 }
 0x3f9   : > { %vm1966_vm12 = vcmp.gt.s32.totalorder %v1965_v2, 0  ;;  %v1439_v57 = vand.u32 2147483647, %v3344_v5  ;;  %v1442_v16 = vand.u32 2139095040, %v3344_v5  ;;  %v976_v22 = vpack.c.bf16 %v971_v7, %v971_v7  ;;  %2596 = vmatprep.subr.bf16.mxu0 %v2846_v4 }
 0x3fa   : > { %v1967_v18 = vsel %vm1966_vm12, %v1965_v2, 0  ;;  %v2460_v20 = vadd.s32 4294967169, %v1236_v39  ;;  %v2575_v23 = vpop.f32.mrf.mxu0  ;;  %v1240_v51 = vor.u32 8388608, %v3373_v48 }
 0x3fb   : > { %v1969_v9 = vand.u32 31, %v1967_v18  ;;  %v1443_v3 = vshrl.u32 %v1442_v16, 23  ;;  %v1446_v29 = vand.u32 8388607, %v1439_v57  ;;  %v3368_v31 = vshrl.u32 %v1967_v18, 5  ;;  %2581 = vmatmul.mubr.msk.bf16.vlgmr.msra.gmra.mxu1 %vm786_vm2, %v976_v22 }
 0x3fc   : > { %v1242_v32 = vadd.s32 1, %v2460_v20  ;;  %2605 = vmatpush3.bf16.msra.mxu1 %v3287_v34  ;;  %2620 = vmatprep.mubr.msk.bf16.mxu1 %vm2853_vm9, %v2846_v4 }
 0x3fd   : > { %v1970_v35 = vsub.s32 32, %v1969_v9  ;;  %v1981_v40 = vshll.u32 %v2850_v27, %v1969_v9  ;;  %v2468_v13 = vadd.s32 4294967169, %v1443_v3  ;;  %v1447_v1 = vor.u32 8388608, %v1446_v29  ;;  %2606 = vmatprep.subr.bf16.mxu1 %v2846_v4  ;;  %2597 = vmatpush3.bf16.msra.mxu0 %v3379_v38 }
 0x3fe   : > { %vm1243_vm13 = vcmp.gt.s32.totalorder %v1242_v32, 0  ;;  %v1984_v28 = vshll.u32 %v2851_v30, %v1969_v9  ;;  %vm1990_vm14 = vcmp.lt.s32.totalorder %v3368_v31, 4  ;;  %v1972_v55 = vshll.u32 %v2847_v19, %v1969_v9  ;;  %2598 = vmatprep.subr.bf16.mxu0 %v2846_v4 }
 0x3ff   : > { %v1982_v15 = vshrl.u32 %v2851_v30, %v1970_v35  ;;  %v1985_v34 = vshrl.u32 %v2852_v33, %v1970_v35  ;;  %v1244_v42 = vsel %vm1243_vm13, %v1242_v32, 0  ;;  %v1449_v47 = vadd.s32 1, %v2468_v13 }
 0x400   : > { %v3390_v46 = vand.u32 31, %v1244_v42  ;;  %v1973_v56 = vshrl.u32 %v2848_v21, %v1970_v35  ;;  %2607 = vmatpush3.bf16.msra.mxu1 %v3297_v36  ;;  %v3399_v58 = vshrl.u32 %v1244_v42, 5  ;;  %v3404_v60 = vshll.u32 %v1447_v1, 8 }
 0x401   : > { %v3394_v52 = vor.u32 %v1982_v15, %v1981_v40  ;;  %v1986_v53 = vor.u32 %v1985_v34, %v1984_v28  ;;  %v3407_v61 = vshrl.u32 %v2847_v19, %v1970_v35  ;;  %2608 = vmatprep.subr.bf16.mxu1 %v2846_v4  ;;  %vm1450_vm15 = vcmp.gt.s32.totalorder %v1449_v47, 0 }
 0x402   : > { %v3402_v59 = vsub.s32 32, %v3390_v46  ;;  %v1258_v62 = vshll.u32 %v2850_v27, %v3390_v46  ;;  %v3415_v36 = vshll.u32 %v2851_v30, %v3390_v46  ;;  %v1975_v63 = vshll.u32 %v2848_v21, %v1969_v9 }
 0x403   : > { %v1451_v7 = vsel %vm1450_vm15, %v1449_v47, 0  ;;  %v1976_v45 = vshrl.u32 %v2849_v24, %v1970_v35  ;;  %v1996_v10 = vsel %vm1990_vm14, %v3394_v52, 920167782  ;;  %v3430_v39 = vsel %vm1990_vm14, %v1986_v53, 1326507024 }
 0x404   : > { %v1259_v2 = vshrl.u32 %v2851_v30, %v3402_v59  ;;  %v3422_v6 = vshrl.u32 %v2852_v33, %v3402_v59  ;;  %v1453_v11 = vand.u32 31, %v1451_v7  ;;  %v1974_v16 = vor.u32 %v1973_v56, %v1972_v55  ;;  %2609 = vmatpush3.bf16.msra.mxu1 %v3308_v41 }
 0x405   : > { %v1452_v18 = vshrl.u32 %v1451_v7, 5  ;;  %v1978_v20 = vshll.u32 %v2849_v24, %v1969_v9  ;;  %v1979_v22 = vshrl.u32 %v2850_v27, %v1970_v35  ;;  %2610 = vmatprep.subr.bf16.mxu1 %v2846_v4  ;;  %v1977_v26 = vor.u32 %v1976_v45, %v1975_v63 }
 0x406   : > { %v3433_v17 = vor.u32 %v1259_v2, %v1258_v62  ;;  %v1263_v23 = vor.u32 %v3422_v6, %v3415_v36  ;;  %v1454_v25 = vsub.s32 32, %v1453_v11  ;;  %vm1987_vm0 = vcmp.lt.s32.totalorder %v3368_v31, 1 }
 0x407   : > { %v1456_v3 = vshll.u32 %v2847_v19, %v1453_v11  ;;  %v1459_v41 = vshll.u32 %v2848_v21, %v1453_v11  ;;  %v1462_v29 = vshll.u32 %v2849_v24, %v1453_v11  ;;  %v1465_v32 = vshll.u32 %v2850_v27, %v1453_v11 }
 0x408   : > { %v1457_v9 = vshrl.u32 %v2848_v21, %v1454_v25  ;;  %v1460_v35 = vshrl.u32 %v2849_v24, %v1454_v25  ;;  %v1463_v40 = vshrl.u32 %v2850_v27, %v1454_v25  ;;  %v1468_v13 = vshll.u32 %v2851_v30, %v1453_v11  ;;  %2611 = vmatpush3.bf16.msra.mxu1 %v3326_v49 }
 0x409   : > { %vm1267_vm1 = vcmp.lt.s32.totalorder %v3399_v58, 4  ;;  %v1455_v1 = vshrl.u32 %v2847_v19, %v1454_v25  ;;  %v1466_v15 = vshrl.u32 %v2851_v30, %v1454_v25  ;;  %v1469_v28 = vshrl.u32 %v2852_v33, %v1454_v25  ;;  %2612 = vmatprep.subr.bf16.mxu1 %v2846_v4 }
 0x40a   : > { %vm1471_vm3 = vcmp.lt.s32.totalorder %v1452_v18, 1  ;;  %v1458_v34 = vor.u32 %v1457_v9, %v1456_v3  ;;  %v1461_v42 = vor.u32 %v1460_v35, %v1459_v41  ;;  %v1464_v47 = vor.u32 %v1463_v40, %v1462_v29 }
 0x40b   : > { %vm1472_vm4 = vcmp.lt.s32.totalorder %v1452_v18, 2  ;;  %v1467_v53 = vor.u32 %v1466_v15, %v1465_v32  ;;  %v1470_v55 = vor.u32 %v1469_v28, %v1468_v13  ;;  %vm1473_vm5 = vcmp.lt.s32.totalorder %v1452_v18, 3 }
 0x40c   : > { %vm1474_vm6 = vcmp.lt.s32.totalorder %v1452_v18, 4  ;;  %v1475_v49 = vsel %vm1471_vm3, %v1455_v1, %v1458_v34  ;;  %v1479_v62 = vsel %vm1471_vm3, %v1458_v34, %v1461_v42  ;;  %v1483_v36 = vsel %vm1471_vm3, %v1461_v42, %v1464_v47  ;;  %2613 = vmatpush3.bf16.msra.mxu1 %v3342_v0 }
 0x40d   : > { %v1476_v56 = vsel %vm1474_vm6, %v1464_v47, 2102212464  ;;  %v1480_v63 = vsel %vm1474_vm6, %v1467_v53, 920167782  ;;  %v1484_v33 = vsel %vm1474_vm6, %v1470_v55, 1326507024  ;;  %v1980_v2 = vor.u32 %v1979_v22, %v1978_v20  ;;  %2614 = vmatprep.subr.bf16.mxu1 %v2846_v4 }
 0x40e   : > { %v1477_v30 = vsel %vm1473_vm5, %v1461_v42, %v1476_v56  ;;  %v1481_v7 = vsel %vm1473_vm5, %v1464_v47, %v1480_v63  ;;  %v1485_v45 = vsel %vm1473_vm5, %v1467_v53, %v1484_v33  ;;  %vm1988_vm8 = vcmp.lt.s32.totalorder %v3368_v31, 2 }
 0x40f   : > { %v1478_v6 = vsel %vm1472_vm4, %v1475_v49, %v1477_v30  ;;  %v1482_v11 = vsel %vm1472_vm4, %v1479_v62, %v1481_v7  ;;  %v1486_v25 = vsel %vm1472_vm4, %v1483_v36, %v1485_v45  ;;  %vm1989_vm10 = vcmp.lt.s32.totalorder %v3368_v31, 3 }
 0x410   : > { %v1991_v0 = vsel %vm1987_vm0, %v3407_v61, %v1974_v16  ;;  %v3466_v20 = vmul.u32.u64.low %v3404_v60, %v1486_v25  ;;  %v3467_v22 = vmul.u32.u64.high %v3404_v60, %v1486_v25, %v3466_v20  ;;  %2615 = vmatpush3.bf16.msra.mxu1 %v3358_v50  ;;  %v1992_v18 = vsel %vm1990_vm14, %v1980_v2, 2102212464 }
 0x411   : > { %v3470_v3 = vmul.u32.u64.low %v3404_v60, %v1482_v11  ;;  %v3471_v41 = vmul.u32.u64.high %v3404_v60, %v1482_v11, %v3470_v3  ;;  %v1995_v29 = vsel %vm1987_vm0, %v1974_v16, %v1977_v26  ;;  %v1997_v32 = vsel %vm1989_vm10, %v1980_v2, %v1996_v10  ;;  %2616 = vmatprep.subr.bf16.mxu1 %v2846_v4 }
 0x412   : > { %v1999_v61 = vsel %vm1987_vm0, %v1977_v26, %v1980_v2  ;;  %v1273_v9 = vsel %vm1267_vm1, %v3433_v17, 920167782  ;;  %v1993_v35 = vsel %vm1989_vm10, %v1977_v26, %v1992_v18  ;;  %v1998_v50 = vsel %vm1988_vm8, %v1995_v29, %v1997_v32 }
 0x413   : > { %v2001_v40 = vsel %vm1989_vm10, %v3394_v52, %v3430_v39  ;;  %v1277_v16 = vsel %vm1267_vm1, %v1263_v23, 1326507024  ;;  %v3494_v13 = vmul.u32.u64.low %v3376_v37, %v1998_v50  ;;  %v3495_v1 = vmul.u32.u64.high %v3376_v37, %v1998_v50, %v3494_v13 }
 0x414   : > { %v2002_v10 = vsel %vm1988_vm8, %v1999_v61, %v2001_v40  ;;  %v1494_v15 = vmul.u32 %v3404_v60, %v1478_v6  ;;  %vm1496_vm11 = vc.u32 %v3467_v22, %v3470_v3  ;;  %v1497_v26 = vadd.s32 1, %v3471_v41  ;;  %2617 = vmatpush3.bf16.msra.mxu1 %v3379_v38 }
 0x415   : > { %v1994_v52 = vsel %vm1988_vm8, %v1991_v0, %v1993_v35  ;;  %v3506_v39 = vmul.u32.u64.low %v3376_v37, %v2002_v10  ;;  %v3507_v23 = vmul.u32.u64.high %v3376_v37, %v2002_v10, %v3506_v39  ;;  %v1249_v28 = vshll.u32 %v2847_v19, %v3390_v46  ;;  %2618 = vmatprep.subr.bf16.mxu1 %v2846_v4 }
 0x416   : > { %v1250_v60 = vshrl.u32 %v2848_v21, %v3402_v59  ;;  %v1498_v34 = vsel %vm1496_vm11, %v1497_v26, %v3471_v41  ;;  %v1252_v31 = vshll.u32 %v2848_v21, %v3390_v46  ;;  %v1253_v38 = vshrl.u32 %v2849_v24, %v3402_v59 }
 0x417   : > { %v1255_v42 = vshll.u32 %v2849_v24, %v3390_v46  ;;  %v1499_v47 = vadd.s32 %v1498_v34, %v1494_v15  ;;  %v2013_v53 = vadd.s32 1, %v3495_v1  ;;  %v1256_v49 = vshrl.u32 %v2850_v27, %v3402_v59 }
 0x418   : > { %v1251_v55 = vor.u32 %v1250_v60, %v1249_v28  ;;  %v2010_v56 = vmul.u32 %v3376_v37, %v1994_v52  ;;  %v1248_v62 = vshrl.u32 %v2847_v19, %v3402_v59  ;;  %v1254_v36 = vor.u32 %v1253_v38, %v1252_v31 }
 0x419   : > { %vm1264_vm12 = vcmp.lt.s32.totalorder %v3399_v58, 1  ;;  %v1500_v21 = vadd.s32 536870912, %v1499_v47  ;;  %vm2012_vm13 = vc.u32 %v3507_v23, %v3494_v13  ;;  %v1257_v24 = vor.u32 %v1256_v49, %v1255_v42 }
 0x41a   : > { %vm1266_vm14 = vcmp.lt.s32.totalorder %v3399_v58, 3  ;;  %v2014_v46 = vsel %vm2012_vm13, %v2013_v53, %v3495_v1  ;;  %vm1265_vm15 = vcmp.lt.s32.totalorder %v3399_v58, 2  ;;  %v1272_v27 = vsel %vm1264_vm12, %v1251_v55, %v1254_v36 }
 0x41b   : > { %v1278_v37 = vsel %vm1266_vm14, %v3433_v17, %v1277_v16  ;;  %v3534_v30 = vshrl.u32 %v1500_v21, 30  ;;  %v2015_v19 = vadd.s32 %v2014_v46, %v2010_v56  ;;  %v1269_v59 = vsel %vm1267_vm1, %v1257_v24, 2102212464 }
 0x41c   : > { %v1274_v63 = vsel %vm1266_vm14, %v1257_v24, %v1273_v9  ;;  %v1268_v33 = vsel %vm1264_vm12, %v1248_v62, %v1251_v55  ;;  %v1276_v6 = vsel %vm1264_vm12, %v1254_v36, %v1257_v24  ;;  %v1280_v7 = vshll.u32 %v1240_v51, 8 }
 0x41d   : > { %v1275_v2 = vsel %vm1265_vm15, %v1272_v27, %v1274_v63  ;;  %v1502_v45 = vshll.u32 %v3534_v30, 30  ;;  %v2016_v11 = vadd.s32 536870912, %v2015_v19  ;;  %v1270_v25 = vsel %vm1266_vm14, %v1254_v36, %v1269_v59 }
 0x41e   : > { %v1279_v17 = vsel %vm1265_vm15, %v1276_v6, %v1278_v37  ;;  %v3548_v41 = vmul.u32.u64.low %v1280_v7, %v1275_v2  ;;  %v3549_v18 = vmul.u32.u64.high %v1280_v7, %v1275_v2, %v3548_v41  ;;  %v1271_v51 = vsel %vm1265_vm15, %v1268_v33, %v1270_v25 }
 0x41f   : > { %v3545_v0 = vmul.u32.u64.low %v1280_v7, %v1279_v17  ;;  %v3546_v20 = vmul.u32.u64.high %v1280_v7, %v1279_v17, %v3545_v0  ;;  %v1503_v29 = vsub.s32 %v1499_v47, %v1502_v45  ;;  %v3552_v32 = vshrl.u32 %v2016_v11, 30 }
 0x420   : > { %v1290_v9 = vadd.s32 1, %v3549_v18  ;;  %v1287_v40 = vmul.u32 %v1280_v7, %v1271_v51  ;;  %v1495_v60 = vadd.s32 %v3470_v3, %v3467_v22  ;;  %v2011_v21 = vadd.s32 %v3494_v13, %v3507_v23 }
 0x421   : > { %v1505_v61 = vsub.s32 0, %v1503_v29  ;;  %v2018_v48 = vshll.u32 %v3552_v32, 30  ;;  %vm1289_vm0 = vc.u32 %v3546_v20, %v3548_v41  ;;  %vm1441_vm4 = vcmp.lt.s32.totalorder %v3344_v5, 0 }
 0x422   : > { %v1291_v16 = vsel %vm1289_vm0, %v1290_v9, %v3549_v18  ;;  %vm3573_vm5 = vcmp.le.f32.partialorder %v1439_v57, 0.7853982  ;;  %v1525_v9 = vsub.s32 4, %v3534_v30  ;;  %vm1957_vm8 = vcmp.lt.s32.totalorder %v3310_v43, 0 }
 0x423   : > { %v2469_v35 = vmin.u32 %v1505_v61, %v1503_v29  ;;  %v2019_v50 = vsub.s32 %v2015_v19, %v2018_v48  ;;  %v1292_v15 = vadd.s32 %v1291_v16, %v1287_v40  ;;  %vm3586_vm10 = vcmp.le.f32.partialorder %v1955_v44, 0.7853982 }
 0x424   : > { %v1526_v44 = vsel %vm1441_vm4, %v1525_v9, %v3534_v30  ;;  %vm1234_vm11 = vcmp.lt.s32.totalorder %v3334_v54, 0  ;;  %vm3619_vm12 = vcmp.le.f32.partialorder %v1232_v14, 0.7853982 }
 0x425   : > { %v1507_v10 = vclz %v2469_v35  ;;  %v2021_v1 = vsub.s32 0, %v2019_v50  ;;  %v1293_v39 = vadd.s32 536870912, %v1292_v15 }
 0x427   : > { %v2470_v26 = vadd.s32 4294967294, %v1507_v10  ;;  %v2486_v52 = vmin.u32 %v2021_v1, %v2019_v50  ;;  %v3563_v42 = vshrl.u32 %v1293_v39, 30  ;;  %v2041_v10 = vsub.s32 4, %v3552_v32 }
 0x429   : > { %vm2471_vm1 = vcmp.lt.s32.totalorder %v2470_v26, 0  ;;  %v2023_v28 = vclz %v2486_v52  ;;  %v1295_v56 = vshll.u32 %v3563_v42, 30 }
 0x42a   : > { %v1510_v58 = vsel %vm2471_vm1, 0, %v2470_v26 }
 0x42b   : > { %v1511_v34 = vsub.s32 32, %v1510_v58  ;;  %v1515_v31 = vsub.s32 4294967266, %v1510_v58  ;;  %v2487_v38 = vadd.s32 4294967294, %v2023_v28  ;;  %v1512_v47 = vshll.u32 %v1503_v29, %v1510_v58 }
 0x42c   : > { %v1296_v22 = vsub.s32 %v1292_v15, %v1295_v56  ;;  %v2042_v28 = vsel %vm1957_vm8, %v2041_v10, %v3552_v32  ;;  %v1318_v56 = vsub.s32 4, %v3563_v42 }
 0x42d   : > { %v1513_v53 = vshrl.u32 %v1495_v60, %v1511_v34  ;;  %v1516_v55 = vadd.s32 127, %v1515_v31  ;;  %vm2488_vm3 = vcmp.lt.s32.totalorder %v2487_v38, 0  ;;  %v3600_v60 = vsel %vm3573_vm5, 0, %v1526_v44 }
 0x42e   : > { %v2026_v49 = vsel %vm2488_vm3, 0, %v2487_v38  ;;  %v1298_v59 = vsub.s32 0, %v1296_v22  ;;  %v2044_v34 = vsel %vm3586_vm10, 0, %v2042_v28 }
 0x42f   : > { %v1514_v62 = vor.u32 %v1513_v53, %v1512_v47  ;;  %v1517_v36 = vshll.u32 %v1516_v55, 23  ;;  %v2027_v24 = vsub.s32 32, %v2026_v49  ;;  %v2031_v46 = vsub.s32 4294967266, %v2026_v49 }
 0x430   : > { %v2028_v37 = vshll.u32 %v2019_v50, %v2026_v49  ;;  %v2461_v7 = vmin.u32 %v1298_v59, %v1296_v22  ;;  %v1288_v50 = vadd.s32 %v3548_v41, %v3546_v20  ;;  %v1532_v53 = vadd.s32 3, %v3600_v60 }
 0x431   : > { %v1518_v3 = vor.u32 4788187, %v1517_v36  ;;  %v2029_v27 = vshrl.u32 %v2011_v21, %v2027_v24  ;;  %v2032_v19 = vadd.s32 127, %v2031_v46  ;;  %v1521_v33 = vcvt.s32.f32 %v1514_v62  ;;  %v1662_v62 = vld [vmem:[%s3780_s11] sm:$0xff]  ;;  %v1663_v36 = vld [vmem:[%s3780_s11 + $0x8] sm:$0xff] }
 0x432   : > { %v1300_v25 = vclz %v2461_v7  ;;  %v2048_v55 = vadd.s32 3, %v2044_v34  ;;  %v2152_v32 = vand.u32 3, %v2044_v34  ;;  %v2457_v34 = vld [vmem:[%s3778_s9] ss:$0 sm:$0xff] }
 0x433   : > { %v1519_v63 = vand.u32 2147483647, %v1518_v3  ;;  %v2030_v2 = vor.u32 %v2029_v27, %v2028_v37  ;;  %v2033_v6 = vshll.u32 %v2032_v19, 23  ;;  %v1679_v3 = vpack.c.bf16 %v1663_v36, %v1662_v62 }
 0x434   : > { %v2462_v0 = vadd.s32 4294967294, %v1300_v25  ;;  %v2049_v27 = vand.u32 3, %v2048_v55  ;;  %vm2153_vm13 = vcmp.lt.s32.totalorder %v2152_v32, 2  ;;  %vm2154_vm14 = vcmp.eq.s32.totalorder %v2152_v32, 0 }
 0x435   : > { %v1522_v45 = vmul.f32 %v1521_v33, %v1519_v63  ;;  %v2034_v11 = vor.u32 4788187, %v2033_v6  ;;  %v2037_v23 = vcvt.s32.f32 %v2030_v2  ;;  %2619 = vmatpush3.bf16.msra.mxu1 %v1679_v3  ;;  %2599 = vmatpush3.bf16.msra.mxu0 %v1679_v3  ;;  %v1319_v63 = vsel %vm1234_vm11, %v1318_v56, %v3563_v42 }
 0x436   : > { %vm2463_vm6 = vcmp.lt.s32.totalorder %v2462_v0, 0  ;;  %2624 = vmatprep.subr.bf16.mxu0 %v2846_v4  ;;  %2636 = vmatprep.subr.bf16.mxu1 %v2846_v4  ;;  %vm2157_vm15 = vcmp.eq.s32.totalorder %v2152_v32, 2  ;;  %vm2054_vm3 = vcmp.eq.s32.totalorder %v2049_v27, 2  ;;  %v1321_v42 = vsel %vm3619_vm12, 0, %v1319_v63 }
 0x437   : > { %v1523_v17 = vxor.u32 2147483648, %v1522_v45  ;;  %v2035_v13 = vand.u32 2147483647, %v2034_v11  ;;  %v1303_v51 = vsel %vm2463_vm6, 0, %v2462_v0  ;;  %v1429_v9 = vand.u32 3, %v1321_v42 }
 0x438   : > { %v1304_v40 = vsub.s32 32, %v1303_v51  ;;  %v1308_v16 = vsub.s32 4294967266, %v1303_v51  ;;  %v1305_v15 = vshll.u32 %v1296_v22, %v1303_v51  ;;  %v1533_v22 = vand.u32 3, %v1532_v53 }
 0x439   : > { %v1524_v18 = vsel %vm1441_vm4, %v1523_v17, %v1522_v45  ;;  %v2038_v61 = vmul.f32 %v2037_v23, %v2035_v13  ;;  %vm2051_vm4 = vcmp.eq.s32.totalorder %v2049_v27, 0 }
 0x43a   : > { %v1527_v48 = vsel %vm3573_vm5, %v3344_v5, %v1524_v18  ;;  %v1306_v26 = vshrl.u32 %v1288_v50, %v1304_v40  ;;  %v1309_v52 = vadd.s32 127, %v1308_v16  ;;  %vm1535_vm0 = vcmp.eq.s32.totalorder %v1533_v22, 0 }
 0x43b   : > { %2762 = vcosq.f32 %v1527_v48  ;;  %v2039_v35 = vxor.u32 2147483648, %v2038_v61  ;;  %vm1538_vm1 = vcmp.eq.s32.totalorder %v1533_v22, 2  ;;  %vm2050_vm5 = vcmp.lt.s32.totalorder %v2049_v27, 2  ;;  %v2229_v27 = vld [vmem:[%s3782_s13 + $0x30] sm:$0xff] }
 0x43c   : > { %2764 = vsinq.f32 %v1527_v48  ;;  %v1307_v41 = vor.u32 %v1306_v26, %v1305_v15  ;;  %v1310_v39 = vshll.u32 %v1309_v52, 23  ;;  %vm1534_vm6 = vcmp.lt.s32.totalorder %v1533_v22, 2 }
 0x43d   : > { %v2040_v1 = vsel %vm1957_vm8, %v2039_v35, %v2038_v61  ;;  %vm2047_vm8 = vweird.f32 %v3310_v43  ;;  %v1325_v48 = vadd.s32 3, %v1321_v42 }
 0x43e   : > { %v2043_v20 = vsel %vm3586_vm10, %v3310_v43, %v2040_v1  ;;  %v1311_v58 = vor.u32 4788187, %v1310_v39  ;;  %v1314_v38 = vcvt.s32.f32 %v1307_v41  ;;  %vm1531_vm10 = vweird.f32 %v3344_v5 }
 0x43f   : > { %2766 = vcosq.f32 %v2043_v20  ;;  %v1636_v43 = vand.u32 3, %v3600_v60  ;;  %v1326_v35 = vand.u32 3, %v1325_v48 }
 0x440   : > { %2768 = vsinq.f32 %v2043_v20  ;;  %v1312_v31 = vand.u32 2147483647, %v1311_v58 }
 0x442   : > { %v1315_v47 = vmul.f32 %v1314_v38, %v1312_v31 }
 0x444   : > { %v1316_v30 = vxor.u32 2147483648, %v1315_v47 }
 0x446   : > { %v1317_v46 = vsel %vm1234_vm11, %v1316_v30, %v1315_v47  ;;  %vm1637_vm11 = vcmp.lt.s32.totalorder %v1636_v43, 2 }
 0x447   : > { %v1320_v37 = vsel %vm3619_vm12, %v3334_v54, %v1317_v46  ;;  %vm1434_vm12 = vcmp.eq.s32.totalorder %v1429_v9, 2 }
 0x448   : > { %v3605_v49 = vpop.eup %2762  ;;  %2770 = vcosq.f32 %v1320_v37 }
 0x449   : > { %v3615_v21 = vpop.eup %2764  ;;  %v1539_v59 = vxor.u32 2147483648, %v3605_v49  ;;  %2772 = vsinq.f32 %v1320_v37  ;;  %v2230_v37 = vld [vmem:[%s3782_s13 + $0x38] sm:$0xff] }
 0x44a   : > { %v1536_v19 = vxor.u32 2147483648, %v3615_v21  ;;  %v2164_v55 = vpop.permute.xlu1 %2163 }
 0x44b   : > { %v1540_v45 = vsel %vm1538_vm1, %v1539_v59, %v3615_v21  ;;  %vm1431_vm1 = vcmp.eq.s32.totalorder %v1429_v9, 0 }
 0x44c   : > { %v2767_v14 = vpop.eup %2766  ;;  %v1537_v7 = vsel %vm1535_vm0, %v3605_v49, %v1536_v19  ;;  %vm1328_vm0 = vcmp.eq.s32.totalorder %v1326_v35, 0 }
 0x44d   : > { %v2769_v33 = vpop.eup %2768  ;;  %v2055_v2 = vxor.u32 2147483648, %v2767_v14  ;;  %v1541_v18 = vsel %vm1534_vm6, %v1537_v7, %v1540_v45  ;;  %vm1660_vm6 = vcmask 785408   ;;  %v2223_v7 = vld [vmem:[%s3782_s13] sm:$0xff]  ;;  %v2224_v45 = vld [vmem:[%s3782_s13 + $0x8] sm:$0xff] }
 0x44e   : > { %v2052_v6 = vxor.u32 2147483648, %v2769_v33  ;;  %v1542_v51 = vsel %vm1531_vm10, nan, %v1541_v18 }
 0x44f   : > { %v2159_v11 = vsel %vm2157_vm15, %v2055_v2, %v2769_v33  ;;  %v2056_v25 = vsel %vm2054_vm3, %v2055_v2, %v2769_v33  ;;  %vm1331_vm15 = vcmp.eq.s32.totalorder %v1326_v35, 2  ;;  %vm1327_vm3 = vcmp.lt.s32.totalorder %v1326_v35, 2  ;;  %v2225_v33 = vld [vmem:[%s3782_s13 + $0x10] sm:$0xff]  ;;  %v2226_v2 = vld [vmem:[%s3782_s13 + $0x18] sm:$0xff] }
 0x450   : > { %v2156_v17 = vsel %vm2154_vm14, %v2767_v14, %v2052_v6  ;;  %v2053_v13 = vsel %vm2051_vm4, %v2767_v14, %v2052_v6  ;;  %vm1641_vm14 = vcmp.eq.s32.totalorder %v1636_v43, 2  ;;  %vm1430_vm4 = vcmp.lt.s32.totalorder %v1429_v9, 2  ;;  %v2228_v14 = vld [vmem:[%s3782_s13 + $0x28] sm:$0xff] }
 0x451   : > { %v2160_v23 = vsel %vm2153_vm13, %v2156_v17, %v2159_v11  ;;  %v2057_v0 = vsel %vm2050_vm5, %v2053_v13, %v2056_v25  ;;  %vm1638_vm13 = vcmp.eq.s32.totalorder %v1636_v43, 0  ;;  %v1643_v1 = vsel %vm1641_vm14, %v1539_v59, %v3615_v21  ;;  %v2476_v25 = vld [vmem:[%s3781_s12] ss:$0 sm:$0xff] }
 0x452   : > { %v2161_v29 = vsel %vm2047_vm8, nan, %v2160_v23  ;;  %v2058_v61 = vsel %vm2047_vm8, nan, %v2057_v0  ;;  %v1640_v10 = vsel %vm1638_vm13, %v3605_v49, %v1536_v19  ;;  %vm1324_vm5 = vweird.f32 %v3334_v54  ;;  %v2227_v19 = vld [vmem:[%s3782_s13 + $0x20] sm:$0xff] }
 0x453   : > { %2171 = vrot.lane.b32.xlu0 %v2161_v29, %s2861_s19  ;;  %2167 = vrot.lane.b32.xlu1 %v2058_v61, %s2862_s2  ;;  %v1644_v44 = vsel %vm1637_vm11, %v1640_v10, %v1643_v1  ;;  %v2174_v49 = vsel %vm786_vm2, %v3278_v8, %v2164_v55  ;;  %v2235_v59 = vpack.c.bf16 %v2230_v37, %v2229_v27  ;;  %v2294_v10 = vld [vmem:[%s3784_s15 + $0x8] sm:$0xff] }
 0x454   : > { %v1645_v60 = vsel %vm1531_vm10, nan, %v1644_v44  ;;  %v2234_v63 = vpack.c.bf16 %v2228_v14, %v2227_v19  ;;  %v2233_v6 = vpack.c.bf16 %v2226_v2, %v2225_v33  ;;  %v2232_v11 = vpack.c.bf16 %v2224_v45, %v2223_v7 }
 0x455   : > { %v2771_v50 = vpop.eup %2770 }
 0x456   : > { %v2773_v40 = vpop.eup %2772  ;;  %v1332_v16 = vxor.u32 2147483648, %v2771_v50 }
 0x457   : > { %1651 = vrot.lane.b32.xlu0 %v1542_v51, %s2862_s2  ;;  %v1329_v57 = vxor.u32 2147483648, %v2773_v40 }
 0x458   : > { %v1333_v15 = vsel %vm1331_vm15, %v1332_v16, %v2773_v40  ;;  %v1436_v26 = vsel %vm1434_vm12, %v1332_v16, %v2773_v40  ;;  %v2296_v40 = vld [vmem:[%s3784_s15 + $0x18] sm:$0xff] }
 0x459   : > { %v1330_v52 = vsel %vm1328_vm0, %v2771_v50, %v1329_v57  ;;  %v1433_v20 = vsel %vm1431_vm1, %v2771_v50, %v1329_v57  ;;  %v2295_v50 = vld [vmem:[%s3784_s15 + $0x10] sm:$0xff]  ;;  %v2293_v57 = vld [vmem:[%s3784_s15] sm:$0xff] }
 0x45a   : > { %v1334_v41 = vsel %vm1327_vm3, %v1330_v52, %v1333_v15  ;;  %v1437_v39 = vsel %vm1430_vm4, %v1433_v20, %v1436_v26  ;;  %v2299_v16 = vpack.c.bf16 %v2296_v40, %v2295_v50  ;;  %v2298_v1 = vpack.c.bf16 %v2294_v10, %v2293_v57  ;;  %v2493_v15 = vld [vmem:[%s3783_s14] ss:$0 sm:$0xff] }
 0x45b   : > { %v1335_v28 = vsel %vm1324_vm5, nan, %v1334_v41  ;;  %v1438_v58 = vsel %vm1324_vm5, nan, %v1437_v39 }
 0x45c   : > { %1647 = vrot.lane.b32.xlu1 %v1438_v58, %s2860_s26 }
 0x460   : > { %1655 = vrot.lane.b32.xlu1 %v1645_v60, %s2861_s19 }
 0x4bb   : > { %v1023_v31 = vpop.f32.mrf.mxu1 }
 0x4bc   : > { %v1024_v38 = vadd.f32 %v2457_v34, %v1023_v31  ;;  %v2496_v31 = vld [vmem:[%s3785_s16] ss:$0 sm:$0xff] }
 0x4bd   : > { %v2582_v54 = vpop.f32.mrf.mxu1 }
 0x4be   : > { %2351 = vrot.lane.b32.xlu1 %v1024_v38, %s2862_s2  ;;  %s2783_s2 = sshll.u32 %s2863_s28, 4  ;;  %s2784_s2 = int_to_ptr.vmem [resolvable:$false] %s2783_s2 }
 0x4bf   : > { %v1026_v47 = vpop.f32.mrf.mxu1  ;;  %s2785_s22 = scalar_lea.vmem %s2784_s2, 256 }
 0x4c1   : > { %v2583_v53 = vpop.f32.mrf.mxu1 }
 0x4c5   : > { %v2168_v5 = vpop.permute.xlu1 %2167  ;;  %v2172_v30 = vpop.permute.xlu0 %2171 }
 0x4c6   : > { %v2175_v32 = vsel %vm857_vm7, %v2174_v49, %v2168_v5 }
 0x4c7   : > { %v2176_v56 = vsel %vm1660_vm6, %v2175_v32, %v2172_v30 }
 0x4c8   : > { %v2177_v62 = vpack.c.bf16 %v2176_v56, %v2176_v56 }
 0x4c9   : > { %v1652_v36 = vpop.permute.xlu0 %1651 }
 0x4ca   : > { %2621 = vmatmul.mubr.bf16.vlgmr.msra.gmra.mxu1 %v2177_v62 }
 0x4cb   : > { %2640 = vmatprep.mubr.msk.bf16.mxu1 %vm2853_vm9, %v2846_v4  ;;  %2637 = vmatpush3.bf16.msra.mxu1 %v2299_v16 }
 0x4cc   : > { %2638 = vmatprep.subr.bf16.mxu1 %v2846_v4 }
 0x4ce   : > { %v1648_v21 = vpop.permute.xlu1 %1647 }
 0x4cf   : > { %v1658_v24 = vsel %vm786_vm2, %v1335_v28, %v1648_v21  ;;  %2639 = vmatpush3.bf16.msra.mxu1 %v2298_v1 }
 0x4d0   : > { %v1659_v46 = vsel %vm857_vm7, %v1658_v24, %v1652_v36 }
 0x4d2   : > { %v1656_v22 = vpop.permute.xlu1 %1655 }
 0x4d3   : > { %v1661_v8 = vsel %vm1660_vm6, %v1659_v46, %v1656_v22 }
 0x4d4   : > { %v1678_v3 = vpack.c.bf16 %v1661_v8, %v1661_v8 }
 0x4d6   : > { %2601 = vmatmul.mubr.bf16.vlgmr.msra.gmra.mxu0 %v1678_v3 }
 0x4d7   : > { %2632 = vmatprep.mubr.msk.bf16.mxu0 %vm2853_vm9, %v2846_v4  ;;  %2625 = vmatpush3.bf16.msra.mxu0 %v2235_v59 }
 0x4d8   : > { %2626 = vmatprep.subr.bf16.mxu0 %v2846_v4 }
 0x4db   : > { %2627 = vmatpush3.bf16.msra.mxu0 %v2234_v63 }
 0x4dc   : > { %2628 = vmatprep.subr.bf16.mxu0 %v2846_v4 }
 0x4df   : > { %2629 = vmatpush3.bf16.msra.mxu0 %v2233_v6 }
 0x4e0   : > { %2630 = vmatprep.subr.bf16.mxu0 %v2846_v4 }
 0x4e3   : > { %2631 = vmatpush3.bf16.msra.mxu0 %v2232_v11 }
 0x530   : > { %v2352_v49 = vpop.permute.xlu1 %2351 }
 0x531   : > { %v2358_v5 = vsel %vm857_vm7, %v3215_v12, %v2352_v49 }
 0x58a   : > { %v2212_v42 = vpop.f32.mrf.mxu1 }
 0x58b   : > { %v2213_v17 = vadd.f32 %v2476_v25, %v2212_v42 }
 0x58c   : > { %v2622_v13 = vpop.f32.mrf.mxu1 }
 0x58d   : > { %2219 = vrot.lane.b32.xlu0 %v2213_v17, %s2860_s26  ;;  %s539_s26 = scalar_lea.vmem [#allocation2], %s2438_s30 }
 0x58e   : > { %v2215_v23 = vpop.f32.mrf.mxu1  ;;  %s2375_s4 = sshll.u32 %s539_s26, 4  ;;  %s2376_s4 = int_to_ptr.vmem [resolvable:$true] %s2375_s4 }
 0x58f   : > { %s2779_s21 = scalar_lea.vmem %s2376_s4, 128  ;;  %p2786_p0 = scmp.lt.s32.totalorder %s2376_s4, %s2784_s2 }
 0x590   : > { %v2623_v0 = vpop.f32.mrf.mxu1  ;;  %p2780_p11 = scmp.ne.s32.totalorder %s2376_s4, %s2779_s21  ;;  %p2787_p1 = scmp.lt.s32.totalorder %s2785_s22, %s2779_s21 }
 0x592   : > { %p2781_p12 = pnand %p2780_p11, %p2992_p5  ;;  %p2788_p2 = por %p2787_p1, %p2786_p0 }
 0x594   : > { %p2782_p13 = pneg %p2781_p12 }
 0x596   : > { %v1728_v18 = vpop.f32.mrf.mxu0  ;;  %p2789_p3 = pnand %p2788_p2, %p2782_p13 }
 0x597   : > { %v1729_v29 = vadd.f32 %v2476_v25, %v1728_v18 }
 0x598   : > { %v2602_v61 = vpop.f32.mrf.mxu0 }
 0x59a   : > { %v1731_v48 = vpop.f32.mrf.mxu0 }
 0x59c   : > { %v2603_v51 = vpop.f32.mrf.mxu0 }
 0x5ff   : > { %v2220_v43 = vpop.permute.xlu0 %2219 }
 0x600   : > { %v2222_v9 = vsel %vm786_vm2, %v1729_v29, %v2220_v43 }
 0x601   : > { %v2231_v35 = vpack.c.bf16 %v2222_v9, %v2222_v9 }
 0x603   : > { %2633 = vmatmul.mubr.msk.bf16.vlgmr.msra.gmra.mxu0 %vm857_vm7, %v2231_v35 }
 0x6c3   : > { %v2280_v26 = vpop.f32.mrf.mxu0 }
 0x6c4   : > { %v2281_v52 = vadd.f32 %v2493_v15, %v2280_v26 }
 0x6c5   : > { %v2634_v20 = vpop.f32.mrf.mxu0 }
 0x6c6   : > { %v2495_v41 = vmul.f32 -1.442695, %v2281_v52 }
 0x6c7   : > { %v2283_v39 = vpop.f32.mrf.mxu0 }
 0x6c8   : > { %2774 = vpow2.f32 %v2495_v41 }
 0x6c9   : > { %v2635_v44 = vpop.f32.mrf.mxu0 }
 0x6d5   : > { %v2775_v28 = vpop.eup %2774 }
 0x6d6   : > { %v2289_v58 = vadd.f32 1.0, %v2775_v28 }
 0x6d8   : > { %2776 = vrcp.f32 %v2289_v58 }
 0x6e5   : > { %v2777_v60 = vpop.eup %2776 }
 0x6e6   : > { %v2292_v34 = vmul.f32 %v2777_v60, %v2281_v52 }
 0x6e8   : > { %v2297_v4 = vpack.c.bf16 %v2292_v34, %v2292_v34 }
 0x6ea   : > { %2641 = vmatmul.mubr.msk.bf16.vlgmr.msra.gmra.mxu1 %vm786_vm2, %v2297_v4 }
 0x7aa   : > { %v2344_v38 = vpop.f32.mrf.mxu1 }
 0x7ab   : > { %v2345_v54 = vadd.f32 %v2496_v31, %v2344_v38 }
 0x7ac   : > { %v2642_v47 = vpop.f32.mrf.mxu1 }
 0x7ad   : > { %2355 = vrot.lane.b32.xlu0 %v2345_v54, %s2861_s19  ;;  %s2362_s19 = scalar_lea.sflag [#allocation3], %s537_s18 }
 0x7ae   : > { %v2347_v53 = vpop.f32.mrf.mxu1 }
 0x7b0   : > { %v2643_v55 = vpop.f32.mrf.mxu1 }
 0x81f   : > { %v2356_v30 = vpop.permute.xlu0 %2355 }
 0x820   : > { %v2359_v32 = vsel %vm1660_vm6, %v2358_v5, %v2356_v30 }
 0x821   : > { %2360 = vst [vmem:[%s539_s26] sm:$0xff] %v2359_v32 }
 0x822   : > { %2792 = shalt.err (!%p2789_p3)
}
 0x823   : > { %s2793_s30 = scalar_lea.hbm %s3733_s29, 128  ;;  %s2797_s26 = scalar_lea.hbm %s3786_s17, 256 }
 0x824   : > { %p2794_p4 = scmp.ne.s32.totalorder %s3733_s29, %s2793_s30  ;;  %p2798_p9 = scmp.lt.s32.totalorder %s3733_s29, %s3786_s17 }
 0x825   : > { %p2799_p10 = scmp.lt.s32.totalorder %s2797_s26, %s2793_s30 }
 0x826   : > { %p2795_p7 = pnand %p2794_p4, %p2992_p5 }
 0x827   : > { %p2800_p11 = por %p2799_p10, %p2798_p9 }
 0x828   : > { %p2796_p8 = pneg %p2795_p7 }
 0x82a   : > { %p2801_p12 = pnand %p2800_p11, %p2796_p8 }
 0x82c   : > { %2804 = shalt.err (!%p2801_p12)
}
 0x82d   : > { %2664 = dma.vmem_to_hbm [thread:$0]  (%p2992_p5), %s2376_s4, 128, %s3733_s29, %s2362_s19  }
 0x82e PF: > { %p2670_p13 = scmp.ge.s32.totalorder %s2839_s27, 2  ;;  %s2387_s21 = sand.u32 1, %s2827_s24  }
 0x82f   : > { %s2388_s28 = scalar_lea.sflag [#allocation3], %s2387_s21 }
 0x830   : > { %p2667_p0 = pnand %p2670_p13, %p2996_p6 }
 0x832   : > { %p2668_p1 = pneg %p2667_p0 }
 0x834   : > { %2822 = dma.done.wait (%p2668_p1), %s2388_s28, 128  }
 0x835   : > { %2824 = vsyncadd (%p2668_p1), %s2388_s28, 4294967168  ;;  %s3820_s27 = sld [smem:[#allocation6_spill]]  ;;  %s3823_s24 = smov %s2831_s25 }
 0x836   : > { %s3821_s2 = sld [smem:[#allocation5_spill]] }
 0x837   : > { %s3822_s26 = sld [smem:[#allocation7_spill]] }
 0x83b   : > { %p27_p2 = scmp.ge.s32.totalorder %s3820_s27, 4  }
 0x83c   : > { %s3824_s25 = smov %s3821_s2 }
 0x83d   :  { %29 = sbr.rel (!%p27_p2) target bundleno = 9 (0x9), region = 123 }
 0x842   :  { %2393 = vsyncpa [#allocation3], 1 }
 0x843   :  { %2395 = vsyncpa [#allocation3 + $0x1], 1 }

</bundles_post_ra>
